<compile_context>
chip_gen: v6e
topology: v6e:2x2x1
jax: 0.10.0
libtpu: 0.0.40
codegen_flags: <defaults>
</compile_context>

<pallas_src>
import jax
import jax.numpy as jnp
from jax import lax
from jax.experimental import pallas as pl
from jax.experimental.pallas import tpu as pltpu


def _round_up(x, m):
    return ((x + m - 1) // m) * m


# -----------------------------------------------------------------------------
# Kernel
# -----------------------------------------------------------------------------
def make_gru_kernel(num_layers, H, Gp, seq_len, Bp):
    L, S = num_layers, seq_len

    def kernel(*refs):
        # refs: x, [w_ih, w_hh, b_gi, b_hn] * L, fc_w, fc_b, out, gi, y
        x_ref = refs[0]                      # (S*Bp, Ip)   bf16
        layer_refs = refs[1:1 + 4 * L]
        fc_w_ref = refs[1 + 4 * L]           # (Gp, Op)     bf16
        fc_b_ref = refs[2 + 4 * L]           # (1, Op)      f32
        out_ref = refs[3 + 4 * L]            # (Bp, Op)     f32
        gi_ref = refs[4 + 4 * L]             # (S*Bp, Gp)   f32 scratch
        y_ref = refs[5 + 4 * L]              # (S*Bp, Gp)   f32 scratch

        # Lane mask keeps the hidden state exactly zero on padded lanes >= H
        # (padded weight rows/cols are zero, so this is belt-and-braces).
        lane_id = lax.broadcasted_iota(jnp.int32, (Bp, Gp), 1)
        h_mask = lane_id < H

        h_last = None
        for l in range(L):
            w_ih = layer_refs[4 * l + 0][...]     # (in_pad, Gp)  bf16
            w_hh = layer_refs[4 * l + 1][...]     # (Gp, Gp)      bf16 (8 vregs)
            b_gi = layer_refs[4 * l + 2][...]     # (1, Gp)       f32
            b_hn = layer_refs[4 * l + 3][...]     # (1, Gp)       f32 (n lanes)

            # Hoisted input projection for ALL timesteps: one big bf16 matmul.
            if l == 0:
                inp_all = x_ref[...]
            else:
                inp_all = y_ref[...].astype(jnp.bfloat16)
            gi_ref[...] = (
                jnp.dot(inp_all, w_ih, preferred_element_type=jnp.float32)
                + b_gi
            )

            # Hoist the bias broadcast out of the unrolled time loop.
            b_hn_b = jnp.broadcast_to(b_hn, (Bp, Gp))
            last_layer = l == L - 1

            def step(t, h, w_hh=w_hh, b_hn_b=b_hn_b, last_layer=last_layer):
                row = pl.multiple_of(t * Bp, Bp)
                gi = gi_ref[pl.ds(row, Bp), :]                     # (Bp, Gp) f32
                gh = jnp.dot(h.astype(jnp.bfloat16), w_hh,
                             preferred_element_type=jnp.float32)   # (Bp, Gp) f32
                # Packed-gate layout: lanes [0,H)=r, [H,2H)=z, [2H,3H)=n.
                rz = jax.nn.sigmoid(gi + gh)          # r valid @[0,H), z @[H,2H)
                r_at_n = pltpu.roll(rz, 2 * H, axis=1)        # r -> lanes [2H,3H)
                n_full = jnp.tanh(gi + r_at_n * (gh + b_hn_b))  # n valid @[2H,3H)
                n0 = pltpu.roll(n_full, Gp - 2 * H, axis=1)   # n -> lanes [0,H)
                z0 = pltpu.roll(rz, Gp - H, axis=1)           # z -> lanes [0,H)
                h_new = (1.0 - z0) * n0 + z0 * h
                h_new = jnp.where(h_mask, h_new, 0.0)
                if not last_layer:
                    y_ref[pl.ds(row, Bp), :] = h_new   # next layer's input seq
                return h_new

            h0 = jnp.zeros((Bp, Gp), jnp.float32)               # h0 = zeros
            h_last = lax.fori_loop(0, S, step, h0, unroll=True)

        # out[:, -1, :] of the GRU == top-layer hidden at last step; lane-dense.
        out_ref[...] = (
            jnp.dot(h_last.astype(jnp.bfloat16), fc_w_ref[...],
                    preferred_element_type=jnp.float32)
            + fc_b_ref[...]
        )

    return kernel


# -----------------------------------------------------------------------------
# One-time parameter preparation (padding / gate packing / bias folding / bf16)
# -----------------------------------------------------------------------------
def prepare_params(params, input_size, hidden_size, num_layers):
    H, I = hidden_size, input_size
    O = params["fc_w"].shape[0]
    Gp = _round_up(3 * H, 128)     # packed gate block (lane-aligned)
    Ip = _round_up(I, 128)
    Op = _round_up(O, 128)

    def pack_w(w, in_real, in_pad):
        # PyTorch (3H, in) -> transposed (in_pad, Gp), gates packed at [0,3H).
        wt = jnp.transpose(w).astype(jnp.float32)            # (in, 3H)  r|z|n
        out = jnp.zeros((in_pad, Gp), jnp.float32).at[:in_real, :3 * H].set(wt)
        return out.astype(jnp.bfloat16)

    def pack_b(b):
        return jnp.zeros((1, Gp), jnp.float32).at[0, :3 * H].set(
            b.astype(jnp.float32))

    layer_inputs = []
    for l in range(num_layers):
        w_ih, w_hh, b_ih, b_hh = params["layers"][l]
        in_real = I if l == 0 else H
        in_pad = Ip if l == 0 else Gp
        b_ih_p = pack_b(b_ih)
        b_hh_p = pack_b(b_hh)
        # Fold b_ih (all gates) + b_hh (r, z gates) into the hoisted GI bias;
        # keep only the n-gate recurrent bias (at its packed lanes) for the loop.
        b_gi = b_ih_p + b_hh_p.at[0, 2 * H:].set(0.0)
        b_hn = jnp.zeros((1, Gp), jnp.float32).at[0, 2 * H:3 * H].set(
            b_hh[2 * H:3 * H].astype(jnp.float32))
        layer_inputs += [pack_w(w_ih, in_real, in_pad),   # (in_pad, Gp) bf16
                         pack_w(w_hh, H, Gp),             # (Gp, Gp)     bf16
                         b_gi,                            # (1, Gp)      f32
                         b_hn]                            # (1, Gp)      f32

    fc_w_p = jnp.zeros((Gp, Op), jnp.float32).at[:H, :O].set(
        jnp.transpose(params["fc_w"]).astype(jnp.float32)).astype(jnp.bfloat16)
    fc_b_p = jnp.zeros((1, Op), jnp.float32).at[0, :O].set(
        params["fc_b"].astype(jnp.float32))

    return {"layer_inputs": layer_inputs, "fc_w": fc_w_p, "fc_b": fc_b_p,
            "H": H, "Gp": Gp, "Ip": Ip, "Op": Op, "O": O}


# -----------------------------------------------------------------------------
# Forward wrapper: pad x, single pallas_call, slice back
# -----------------------------------------------------------------------------
def gru_model_forward(x, prepared, *, num_layers):
    B, S, I = x.shape
    H, Gp, Ip, Op, O = (prepared[k] for k in ("H", "Gp", "Ip", "Op", "O"))
    Bp = _round_up(B, 8)           # f32 sublane tile

    # Time-major, batch/feature zero-padded, flat (S*Bp, Ip), bf16 operand.
    x_tm = jnp.transpose(x.astype(jnp.float32), (1, 0, 2))          # (S, B, I)
    x_pad = jnp.zeros((S, Bp, Ip), jnp.float32).at[:, :B, :I].set(x_tm)
    x_flat = x_pad.reshape(S * Bp, Ip).astype(jnp.bfloat16)

    kernel = make_gru_kernel(num_layers, H, Gp, S, Bp)
    out_padded = pl.pallas_call(
        kernel,
        out_shape=jax.ShapeDtypeStruct((Bp, Op), jnp.float32),
        scratch_shapes=[
            pltpu.VMEM((S * Bp, Gp), jnp.float32),   # hoisted GI per layer
            pltpu.VMEM((S * Bp, Gp), jnp.float32),   # layer output sequence
        ],
    )(x_flat, *prepared["layer_inputs"], prepared["fc_w"], prepared["fc_b"])
    return out_padded[:B, :O]


# -----------------------------------------------------------------------------
# Deterministic parameter init (PyTorch shapes: weight_ih (3H, in), etc.)
# -----------------------------------------------------------------------------
def init_params(key, input_size, hidden_size, num_layers, output_size):
    k_gru = 1.0 / jnp.sqrt(hidden_size)
    k_fc = 1.0 / jnp.sqrt(hidden_size)
    layers = []
    for l in range(num_layers):
        in_l = input_size if l == 0 else hidden_size
        key, k1, k2, k3, k4 = jax.random.split(key, 5)
        w_ih = jax.random.uniform(k1, (3 * hidden_size, in_l),
                                  minval=-k_gru, maxval=k_gru, dtype=jnp.float32)
        w_hh = jax.random.uniform(k2, (3 * hidden_size, hidden_size),
                                  minval=-k_gru, maxval=k_gru, dtype=jnp.float32)
        b_ih = jax.random.uniform(k3, (3 * hidden_size,),
                                  minval=-k_gru, maxval=k_gru, dtype=jnp.float32)
        b_hh = jax.random.uniform(k4, (3 * hidden_size,),
                                  minval=-k_gru, maxval=k_gru, dtype=jnp.float32)
        layers.append((w_ih, w_hh, b_ih, b_hh))
    key, kw, kb = jax.random.split(key, 3)
    fc_w = jax.random.uniform(kw, (output_size, hidden_size),
                              minval=-k_fc, maxval=k_fc, dtype=jnp.float32)
    fc_b = jax.random.uniform(kb, (output_size,),
                              minval=-k_fc, maxval=k_fc, dtype=jnp.float32)
    return {"layers": layers, "fc_w": fc_w, "fc_b": fc_b}


# -----------------------------------------------------------------------------
# Pure-JAX reference (PyTorch nn.GRU semantics, f32) for a correctness check
# -----------------------------------------------------------------------------
def gru_model_ref(x, params, *, hidden_size, num_layers):
    H = hidden_size
    B, S, _ = x.shape
    h = [jnp.zeros((B, H), jnp.float32) for _ in range(num_layers)]
    for t in range(S):
        inp = x[:, t, :]
        for l in range(num_layers):
            w_ih, w_hh, b_ih, b_hh = params["layers"][l]
            gi = inp @ w_ih.T + b_ih
            gh = h[l] @ w_hh.T + b_hh
            r = jax.nn.sigmoid(gi[:, :H] + gh[:, :H])
            z = jax.nn.sigmoid(gi[:, H:2 * H] + gh[:, H:2 * H])
            n = jnp.tanh(gi[:, 2 * H:] + r * gh[:, 2 * H:])
            h[l] = (1.0 - z) * n + z * h[l]
            inp = h[l]
    return h[-1] @ params["fc_w"].T + params["fc_b"]


if __name__ == "__main__":
    input_size = 4
    hidden_size = 32
    num_layers = 2
    output_size = 1
    batch, seq = 2, 8

    key = jax.random.PRNGKey(0)
    key, kx = jax.random.split(key)
    x = jax.random.normal(kx, (batch, seq, input_size), dtype=jnp.float32)
    params = init_params(key, input_size, hidden_size, num_layers, output_size)

    # One-time (init-path) weight preparation; reused across forward calls.
    prepared = prepare_params(params, input_size, hidden_size, num_layers)

    out = gru_model_forward(x, prepared, num_layers=num_layers)
    out = jax.block_until_ready(out)

    ref = gru_model_ref(x, params,
                        hidden_size=hidden_size, num_layers=num_layers)
    assert out.shape == (batch, output_size)
    # bf16 matmul operands -> looser tolerance than the pure-f32 version.
    assert jnp.allclose(out, ref, atol=3e-2, rtol=3e-2), (out, ref)

    print("KERNEL_OK")
</pallas_src>

<mosaic_0001>
module attributes {stable_mosaic.version = 11 : i64} {
  func.func @kernel(%arg0: memref<64x128xbf16, #tpu.memory_space<vmem>>, %arg1: memref<128x128xbf16, #tpu.memory_space<vmem>>, %arg2: memref<128x128xbf16, #tpu.memory_space<vmem>>, %arg3: memref<1x128xf32, #tpu.memory_space<vmem>>, %arg4: memref<1x128xf32, #tpu.memory_space<vmem>>, %arg5: memref<128x128xbf16, #tpu.memory_space<vmem>>, %arg6: memref<128x128xbf16, #tpu.memory_space<vmem>>, %arg7: memref<1x128xf32, #tpu.memory_space<vmem>>, %arg8: memref<1x128xf32, #tpu.memory_space<vmem>>, %arg9: memref<128x128xbf16, #tpu.memory_space<vmem>>, %arg10: memref<1x128xf32, #tpu.memory_space<vmem>>, %arg11: memref<8x128xf32, #tpu.memory_space<vmem>>, %arg12: memref<64x128xf32, #tpu.memory_space<vmem>>, %arg13: memref<64x128xf32, #tpu.memory_space<vmem>>) attributes {dimension_semantics = [], scalar_prefetch = 0 : i64, scratch_operands = 2 : i64, tpu.core_type = #tpu.core_type<tc>} {
    %0 = tpu.iota {dimensions = array<i32: 1>} : vector<8x128xi32>
    %c32_i32 = arith.constant 32 : i32
    %1 = vector.broadcast %c32_i32 : i32 to vector<8x128xi32>
    %2 = arith.cmpi slt, %0, %1 : vector<8x128xi32>
    %c0 = arith.constant 0 : index
    %c0_0 = arith.constant 0 : index
    %3 = vector.load %arg1[%c0, %c0_0] : memref<128x128xbf16, #tpu.memory_space<vmem>>, vector<128x128xbf16>
    %c0_1 = arith.constant 0 : index
    %c0_2 = arith.constant 0 : index
    %4 = vector.load %arg2[%c0_1, %c0_2] : memref<128x128xbf16, #tpu.memory_space<vmem>>, vector<128x128xbf16>
    %c0_3 = arith.constant 0 : index
    %c0_4 = arith.constant 0 : index
    %5 = vector.load %arg3[%c0_3, %c0_4] : memref<1x128xf32, #tpu.memory_space<vmem>>, vector<1x128xf32>
    %c0_5 = arith.constant 0 : index
    %c0_6 = arith.constant 0 : index
    %6 = vector.load %arg4[%c0_5, %c0_6] : memref<1x128xf32, #tpu.memory_space<vmem>>, vector<1x128xf32>
    %c0_7 = arith.constant 0 : index
    %c0_8 = arith.constant 0 : index
    %7 = vector.load %arg0[%c0_7, %c0_8] : memref<64x128xbf16, #tpu.memory_space<vmem>>, vector<64x128xbf16>
    %cst = arith.constant dense<0.000000e+00> : vector<64x128xf32>
    %8 = tpu.matmul %7, %3, %cst {dimension_numbers = #tpu.dot_dimension_numbers<[1], [0], [0], [1], [0, 0, 1, 1], [], []>} : vector<64x128xbf16>, vector<128x128xbf16>, vector<64x128xf32> -> vector<64x128xf32>
    %9 = vector.broadcast %5 : vector<1x128xf32> to vector<64x128xf32>
    %10 = arith.addf %8, %9 : vector<64x128xf32>
    %c0_9 = arith.constant 0 : index
    %c0_10 = arith.constant 0 : index
    %11 = vector.load %arg12[%c0_9, %c0_10] : memref<64x128xf32, #tpu.memory_space<vmem>>, vector<64x128xf32>
    tpu.vector_store %arg12[%c0_9, %c0_10], %10 {strides = array<i32>} : memref<64x128xf32, #tpu.memory_space<vmem>>, vector<64x128xf32>,
    %12 = vector.shape_cast %6 : vector<1x128xf32> to vector<1x128xf32>
    %13 = vector.broadcast %12 : vector<1x128xf32> to vector<8x128xf32>
    %cst_11 = arith.constant 0.000000e+00 : f32
    %14 = vector.broadcast %cst_11 : f32 to vector<8x128xf32>
    %c0_i32 = arith.constant 0 : i32
    %c8_i32 = arith.constant 8 : i32
    %15 = arith.muli %c0_i32, %c8_i32 : i32
    %16 = tpu.assume_multiple %15, 8 : i32
    %17 = arith.index_cast %16 : i32 to index
    %c0_12 = arith.constant 0 : index
    %18 = vector.load %arg12[%17, %c0_12] : memref<64x128xf32, #tpu.memory_space<vmem>>, vector<8x128xf32>
    %19 = arith.truncf %14 : vector<8x128xf32> to vector<8x128xbf16>
    %cst_13 = arith.constant dense<0.000000e+00> : vector<8x128xf32>
    %20 = tpu.matmul %19, %4, %cst_13 {dimension_numbers = #tpu.dot_dimension_numbers<[1], [0], [0], [1], [0, 0, 1, 1], [], []>} : vector<8x128xbf16>, vector<128x128xbf16>, vector<8x128xf32> -> vector<8x128xf32>
    %21 = arith.addf %18, %20 : vector<8x128xf32>
    %22 = arith.negf %21 : vector<8x128xf32>
    %23 = math.exp %22 : vector<8x128xf32>
    %cst_14 = arith.constant 1.000000e+00 : f32
    %24 = vector.broadcast %cst_14 : f32 to vector<8x128xf32>
    %25 = arith.addf %24, %23 : vector<8x128xf32>
    %26 = arith.divf %24, %25 : vector<8x128xf32>
    %c64_i32 = arith.constant 64 : i32
    %27 = tpu.dynamic_rotate %26 by %c64_i32 dim 1 : vector<8x128xf32>, i32 -> vector<8x128xf32>
    %28 = arith.addf %20, %13 : vector<8x128xf32>
    %29 = arith.mulf %27, %28 : vector<8x128xf32>
    %30 = arith.addf %18, %29 : vector<8x128xf32>
    %31 = math.tanh %30 : vector<8x128xf32>
    %c64_i32_15 = arith.constant 64 : i32
    %32 = tpu.dynamic_rotate %31 by %c64_i32_15 dim 1 : vector<8x128xf32>, i32 -> vector<8x128xf32>
    %c96_i32 = arith.constant 96 : i32
    %33 = tpu.dynamic_rotate %26 by %c96_i32 dim 1 : vector<8x128xf32>, i32 -> vector<8x128xf32>
    %cst_16 = arith.constant 1.000000e+00 : f32
    %34 = vector.broadcast %cst_16 : f32 to vector<8x128xf32>
    %35 = arith.subf %34, %33 : vector<8x128xf32>
    %36 = arith.mulf %35, %32 : vector<8x128xf32>
    %37 = arith.mulf %33, %14 : vector<8x128xf32>
    %38 = arith.addf %36, %37 : vector<8x128xf32>
    %cst_17 = arith.constant 0.000000e+00 : f32
    %39 = vector.broadcast %cst_17 : f32 to vector<8x128xf32>
    %40 = arith.select %2, %38, %39 : vector<8x128xi1>, vector<8x128xf32>
    %41 = arith.index_cast %16 : i32 to index
    %c0_18 = arith.constant 0 : index
    %42 = vector.load %arg13[%41, %c0_18] : memref<64x128xf32, #tpu.memory_space<vmem>>, vector<8x128xf32>
    tpu.vector_store %arg13[%41, %c0_18], %40 {strides = array<i32>} : memref<64x128xf32, #tpu.memory_space<vmem>>, vector<8x128xf32>,
    %c1_i32 = arith.constant 1 : i32
    %c8_i32_19 = arith.constant 8 : i32
    %43 = arith.muli %c1_i32, %c8_i32_19 : i32
    %44 = tpu.assume_multiple %43, 8 : i32
    %45 = arith.index_cast %44 : i32 to index
    %c0_20 = arith.constant 0 : index
    %46 = vector.load %arg12[%45, %c0_20] : memref<64x128xf32, #tpu.memory_space<vmem>>, vector<8x128xf32>
    %47 = arith.truncf %40 : vector<8x128xf32> to vector<8x128xbf16>
    %cst_21 = arith.constant dense<0.000000e+00> : vector<8x128xf32>
    %48 = tpu.matmul %47, %4, %cst_21 {dimension_numbers = #tpu.dot_dimension_numbers<[1], [0], [0], [1], [0, 0, 1, 1], [], []>} : vector<8x128xbf16>, vector<128x128xbf16>, vector<8x128xf32> -> vector<8x128xf32>
    %49 = arith.addf %46, %48 : vector<8x128xf32>
    %50 = arith.negf %49 : vector<8x128xf32>
    %51 = math.exp %50 : vector<8x128xf32>
    %cst_22 = arith.constant 1.000000e+00 : f32
    %52 = vector.broadcast %cst_22 : f32 to vector<8x128xf32>
    %53 = arith.addf %52, %51 : vector<8x128xf32>
    %54 = arith.divf %52, %53 : vector<8x128xf32>
    %c64_i32_23 = arith.constant 64 : i32
    %55 = tpu.dynamic_rotate %54 by %c64_i32_23 dim 1 : vector<8x128xf32>, i32 -> vector<8x128xf32>
    %56 = arith.addf %48, %13 : vector<8x128xf32>
    %57 = arith.mulf %55, %56 : vector<8x128xf32>
    %58 = arith.addf %46, %57 : vector<8x128xf32>
    %59 = math.tanh %58 : vector<8x128xf32>
    %c64_i32_24 = arith.constant 64 : i32
    %60 = tpu.dynamic_rotate %59 by %c64_i32_24 dim 1 : vector<8x128xf32>, i32 -> vector<8x128xf32>
    %c96_i32_25 = arith.constant 96 : i32
    %61 = tpu.dynamic_rotate %54 by %c96_i32_25 dim 1 : vector<8x128xf32>, i32 -> vector<8x128xf32>
    %cst_26 = arith.constant 1.000000e+00 : f32
    %62 = vector.broadcast %cst_26 : f32 to vector<8x128xf32>
    %63 = arith.subf %62, %61 : vector<8x128xf32>
    %64 = arith.mulf %63, %60 : vector<8x128xf32>
    %65 = arith.mulf %61, %40 : vector<8x128xf32>
    %66 = arith.addf %64, %65 : vector<8x128xf32>
    %cst_27 = arith.constant 0.000000e+00 : f32
    %67 = vector.broadcast %cst_27 : f32 to vector<8x128xf32>
    %68 = arith.select %2, %66, %67 : vector<8x128xi1>, vector<8x128xf32>
    %69 = arith.index_cast %44 : i32 to index
    %c0_28 = arith.constant 0 : index
    %70 = vector.load %arg13[%69, %c0_28] : memref<64x128xf32, #tpu.memory_space<vmem>>, vector<8x128xf32>
    tpu.vector_store %arg13[%69, %c0_28], %68 {strides = array<i32>} : memref<64x128xf32, #tpu.memory_space<vmem>>, vector<8x128xf32>,
    %c2_i32 = arith.constant 2 : i32
    %c8_i32_29 = arith.constant 8 : i32
    %71 = arith.muli %c2_i32, %c8_i32_29 : i32
    %72 = tpu.assume_multiple %71, 8 : i32
    %73 = arith.index_cast %72 : i32 to index
    %c0_30 = arith.constant 0 : index
    %74 = vector.load %arg12[%73, %c0_30] : memref<64x128xf32, #tpu.memory_space<vmem>>, vector<8x128xf32>
    %75 = arith.truncf %68 : vector<8x128xf32> to vector<8x128xbf16>
    %cst_31 = arith.constant dense<0.000000e+00> : vector<8x128xf32>
    %76 = tpu.matmul %75, %4, %cst_31 {dimension_numbers = #tpu.dot_dimension_numbers<[1], [0], [0], [1], [0, 0, 1, 1], [], []>} : vector<8x128xbf16>, vector<128x128xbf16>, vector<8x128xf32> -> vector<8x128xf32>
    %77 = arith.addf %74, %76 : vector<8x128xf32>
    %78 = arith.negf %77 : vector<8x128xf32>
    %79 = math.exp %78 : vector<8x128xf32>
    %cst_32 = arith.constant 1.000000e+00 : f32
    %80 = vector.broadcast %cst_32 : f32 to vector<8x128xf32>
    %81 = arith.addf %80, %79 : vector<8x128xf32>
    %82 = arith.divf %80, %81 : vector<8x128xf32>
    %c64_i32_33 = arith.constant 64 : i32
    %83 = tpu.dynamic_rotate %82 by %c64_i32_33 dim 1 : vector<8x128xf32>, i32 -> vector<8x128xf32>
    %84 = arith.addf %76, %13 : vector<8x128xf32>
    %85 = arith.mulf %83, %84 : vector<8x128xf32>
    %86 = arith.addf %74, %85 : vector<8x128xf32>
    %87 = math.tanh %86 : vector<8x128xf32>
    %c64_i32_34 = arith.constant 64 : i32
    %88 = tpu.dynamic_rotate %87 by %c64_i32_34 dim 1 : vector<8x128xf32>, i32 -> vector<8x128xf32>
    %c96_i32_35 = arith.constant 96 : i32
    %89 = tpu.dynamic_rotate %82 by %c96_i32_35 dim 1 : vector<8x128xf32>, i32 -> vector<8x128xf32>
    %cst_36 = arith.constant 1.000000e+00 : f32
    %90 = vector.broadcast %cst_36 : f32 to vector<8x128xf32>
    %91 = arith.subf %90, %89 : vector<8x128xf32>
    %92 = arith.mulf %91, %88 : vector<8x128xf32>
    %93 = arith.mulf %89, %68 : vector<8x128xf32>
    %94 = arith.addf %92, %93 : vector<8x128xf32>
    %cst_37 = arith.constant 0.000000e+00 : f32
    %95 = vector.broadcast %cst_37 : f32 to vector<8x128xf32>
    %96 = arith.select %2, %94, %95 : vector<8x128xi1>, vector<8x128xf32>
    %97 = arith.index_cast %72 : i32 to index
    %c0_38 = arith.constant 0 : index
    %98 = vector.load %arg13[%97, %c0_38] : memref<64x128xf32, #tpu.memory_space<vmem>>, vector<8x128xf32>
    tpu.vector_store %arg13[%97, %c0_38], %96 {strides = array<i32>} : memref<64x128xf32, #tpu.memory_space<vmem>>, vector<8x128xf32>,
    %c3_i32 = arith.constant 3 : i32
    %c8_i32_39 = arith.constant 8 : i32
    %99 = arith.muli %c3_i32, %c8_i32_39 : i32
    %100 = tpu.assume_multiple %99, 8 : i32
    %101 = arith.index_cast %100 : i32 to index
    %c0_40 = arith.constant 0 : index
    %102 = vector.load %arg12[%101, %c0_40] : memref<64x128xf32, #tpu.memory_space<vmem>>, vector<8x128xf32>
    %103 = arith.truncf %96 : vector<8x128xf32> to vector<8x128xbf16>
    %cst_41 = arith.constant dense<0.000000e+00> : vector<8x128xf32>
    %104 = tpu.matmul %103, %4, %cst_41 {dimension_numbers = #tpu.dot_dimension_numbers<[1], [0], [0], [1], [0, 0, 1, 1], [], []>} : vector<8x128xbf16>, vector<128x128xbf16>, vector<8x128xf32> -> vector<8x128xf32>
    %105 = arith.addf %102, %104 : vector<8x128xf32>
    %106 = arith.negf %105 : vector<8x128xf32>
    %107 = math.exp %106 : vector<8x128xf32>
    %cst_42 = arith.constant 1.000000e+00 : f32
    %108 = vector.broadcast %cst_42 : f32 to vector<8x128xf32>
    %109 = arith.addf %108, %107 : vector<8x128xf32>
    %110 = arith.divf %108, %109 : vector<8x128xf32>
    %c64_i32_43 = arith.constant 64 : i32
    %111 = tpu.dynamic_rotate %110 by %c64_i32_43 dim 1 : vector<8x128xf32>, i32 -> vector<8x128xf32>
    %112 = arith.addf %104, %13 : vector<8x128xf32>
    %113 = arith.mulf %111, %112 : vector<8x128xf32>
    %114 = arith.addf %102, %113 : vector<8x128xf32>
    %115 = math.tanh %114 : vector<8x128xf32>
    %c64_i32_44 = arith.constant 64 : i32
    %116 = tpu.dynamic_rotate %115 by %c64_i32_44 dim 1 : vector<8x128xf32>, i32 -> vector<8x128xf32>
    %c96_i32_45 = arith.constant 96 : i32
    %117 = tpu.dynamic_rotate %110 by %c96_i32_45 dim 1 : vector<8x128xf32>, i32 -> vector<8x128xf32>
    %cst_46 = arith.constant 1.000000e+00 : f32
    %118 = vector.broadcast %cst_46 : f32 to vector<8x128xf32>
    %119 = arith.subf %118, %117 : vector<8x128xf32>
    %120 = arith.mulf %119, %116 : vector<8x128xf32>
    %121 = arith.mulf %117, %96 : vector<8x128xf32>
    %122 = arith.addf %120, %121 : vector<8x128xf32>
    %cst_47 = arith.constant 0.000000e+00 : f32
    %123 = vector.broadcast %cst_47 : f32 to vector<8x128xf32>
    %124 = arith.select %2, %122, %123 : vector<8x128xi1>, vector<8x128xf32>
    %125 = arith.index_cast %100 : i32 to index
    %c0_48 = arith.constant 0 : index
    %126 = vector.load %arg13[%125, %c0_48] : memref<64x128xf32, #tpu.memory_space<vmem>>, vector<8x128xf32>
    tpu.vector_store %arg13[%125, %c0_48], %124 {strides = array<i32>} : memref<64x128xf32, #tpu.memory_space<vmem>>, vector<8x128xf32>,
    %c4_i32 = arith.constant 4 : i32
    %c8_i32_49 = arith.constant 8 : i32
    %127 = arith.muli %c4_i32, %c8_i32_49 : i32
    %128 = tpu.assume_multiple %127, 8 : i32
    %129 = arith.index_cast %128 : i32 to index
    %c0_50 = arith.constant 0 : index
    %130 = vector.load %arg12[%129, %c0_50] : memref<64x128xf32, #tpu.memory_space<vmem>>, vector<8x128xf32>
    %131 = arith.truncf %124 : vector<8x128xf32> to vector<8x128xbf16>
    %cst_51 = arith.constant dense<0.000000e+00> : vector<8x128xf32>
    %132 = tpu.matmul %131, %4, %cst_51 {dimension_numbers = #tpu.dot_dimension_numbers<[1], [0], [0], [1], [0, 0, 1, 1], [], []>} : vector<8x128xbf16>, vector<128x128xbf16>, vector<8x128xf32> -> vector<8x128xf32>
    %133 = arith.addf %130, %132 : vector<8x128xf32>
    %134 = arith.negf %133 : vector<8x128xf32>
    %135 = math.exp %134 : vector<8x128xf32>
    %cst_52 = arith.constant 1.000000e+00 : f32
    %136 = vector.broadcast %cst_52 : f32 to vector<8x128xf32>
    %137 = arith.addf %136, %135 : vector<8x128xf32>
    %138 = arith.divf %136, %137 : vector<8x128xf32>
    %c64_i32_53 = arith.constant 64 : i32
    %139 = tpu.dynamic_rotate %138 by %c64_i32_53 dim 1 : vector<8x128xf32>, i32 -> vector<8x128xf32>
    %140 = arith.addf %132, %13 : vector<8x128xf32>
    %141 = arith.mulf %139, %140 : vector<8x128xf32>
    %142 = arith.addf %130, %141 : vector<8x128xf32>
    %143 = math.tanh %142 : vector<8x128xf32>
    %c64_i32_54 = arith.constant 64 : i32
    %144 = tpu.dynamic_rotate %143 by %c64_i32_54 dim 1 : vector<8x128xf32>, i32 -> vector<8x128xf32>
    %c96_i32_55 = arith.constant 96 : i32
    %145 = tpu.dynamic_rotate %138 by %c96_i32_55 dim 1 : vector<8x128xf32>, i32 -> vector<8x128xf32>
    %cst_56 = arith.constant 1.000000e+00 : f32
    %146 = vector.broadcast %cst_56 : f32 to vector<8x128xf32>
    %147 = arith.subf %146, %145 : vector<8x128xf32>
    %148 = arith.mulf %147, %144 : vector<8x128xf32>
    %149 = arith.mulf %145, %124 : vector<8x128xf32>
    %150 = arith.addf %148, %149 : vector<8x128xf32>
    %cst_57 = arith.constant 0.000000e+00 : f32
    %151 = vector.broadcast %cst_57 : f32 to vector<8x128xf32>
    %152 = arith.select %2, %150, %151 : vector<8x128xi1>, vector<8x128xf32>
    %153 = arith.index_cast %128 : i32 to index
    %c0_58 = arith.constant 0 : index
    %154 = vector.load %arg13[%153, %c0_58] : memref<64x128xf32, #tpu.memory_space<vmem>>, vector<8x128xf32>
    tpu.vector_store %arg13[%153, %c0_58], %152 {strides = array<i32>} : memref<64x128xf32, #tpu.memory_space<vmem>>, vector<8x128xf32>,
    %c5_i32 = arith.constant 5 : i32
    %c8_i32_59 = arith.constant 8 : i32
    %155 = arith.muli %c5_i32, %c8_i32_59 : i32
    %156 = tpu.assume_multiple %155, 8 : i32
    %157 = arith.index_cast %156 : i32 to index
    %c0_60 = arith.constant 0 : index
    %158 = vector.load %arg12[%157, %c0_60] : memref<64x128xf32, #tpu.memory_space<vmem>>, vector<8x128xf32>
    %159 = arith.truncf %152 : vector<8x128xf32> to vector<8x128xbf16>
    %cst_61 = arith.constant dense<0.000000e+00> : vector<8x128xf32>
    %160 = tpu.matmul %159, %4, %cst_61 {dimension_numbers = #tpu.dot_dimension_numbers<[1], [0], [0], [1], [0, 0, 1, 1], [], []>} : vector<8x128xbf16>, vector<128x128xbf16>, vector<8x128xf32> -> vector<8x128xf32>
    %161 = arith.addf %158, %160 : vector<8x128xf32>
    %162 = arith.negf %161 : vector<8x128xf32>
    %163 = math.exp %162 : vector<8x128xf32>
    %cst_62 = arith.constant 1.000000e+00 : f32
    %164 = vector.broadcast %cst_62 : f32 to vector<8x128xf32>
    %165 = arith.addf %164, %163 : vector<8x128xf32>
    %166 = arith.divf %164, %165 : vector<8x128xf32>
    %c64_i32_63 = arith.constant 64 : i32
    %167 = tpu.dynamic_rotate %166 by %c64_i32_63 dim 1 : vector<8x128xf32>, i32 -> vector<8x128xf32>
    %168 = arith.addf %160, %13 : vector<8x128xf32>
    %169 = arith.mulf %167, %168 : vector<8x128xf32>
    %170 = arith.addf %158, %169 : vector<8x128xf32>
    %171 = math.tanh %170 : vector<8x128xf32>
    %c64_i32_64 = arith.constant 64 : i32
    %172 = tpu.dynamic_rotate %171 by %c64_i32_64 dim 1 : vector<8x128xf32>, i32 -> vector<8x128xf32>
    %c96_i32_65 = arith.constant 96 : i32
    %173 = tpu.dynamic_rotate %166 by %c96_i32_65 dim 1 : vector<8x128xf32>, i32 -> vector<8x128xf32>
    %cst_66 = arith.constant 1.000000e+00 : f32
    %174 = vector.broadcast %cst_66 : f32 to vector<8x128xf32>
    %175 = arith.subf %174, %173 : vector<8x128xf32>
    %176 = arith.mulf %175, %172 : vector<8x128xf32>
    %177 = arith.mulf %173, %152 : vector<8x128xf32>
    %178 = arith.addf %176, %177 : vector<8x128xf32>
    %cst_67 = arith.constant 0.000000e+00 : f32
    %179 = vector.broadcast %cst_67 : f32 to vector<8x128xf32>
    %180 = arith.select %2, %178, %179 : vector<8x128xi1>, vector<8x128xf32>
    %181 = arith.index_cast %156 : i32 to index
    %c0_68 = arith.constant 0 : index
    %182 = vector.load %arg13[%181, %c0_68] : memref<64x128xf32, #tpu.memory_space<vmem>>, vector<8x128xf32>
    tpu.vector_store %arg13[%181, %c0_68], %180 {strides = array<i32>} : memref<64x128xf32, #tpu.memory_space<vmem>>, vector<8x128xf32>,
    %c6_i32 = arith.constant 6 : i32
    %c8_i32_69 = arith.constant 8 : i32
    %183 = arith.muli %c6_i32, %c8_i32_69 : i32
    %184 = tpu.assume_multiple %183, 8 : i32
    %185 = arith.index_cast %184 : i32 to index
    %c0_70 = arith.constant 0 : index
    %186 = vector.load %arg12[%185, %c0_70] : memref<64x128xf32, #tpu.memory_space<vmem>>, vector<8x128xf32>
    %187 = arith.truncf %180 : vector<8x128xf32> to vector<8x128xbf16>
    %cst_71 = arith.constant dense<0.000000e+00> : vector<8x128xf32>
    %188 = tpu.matmul %187, %4, %cst_71 {dimension_numbers = #tpu.dot_dimension_numbers<[1], [0], [0], [1], [0, 0, 1, 1], [], []>} : vector<8x128xbf16>, vector<128x128xbf16>, vector<8x128xf32> -> vector<8x128xf32>
    %189 = arith.addf %186, %188 : vector<8x128xf32>
    %190 = arith.negf %189 : vector<8x128xf32>
    %191 = math.exp %190 : vector<8x128xf32>
    %cst_72 = arith.constant 1.000000e+00 : f32
    %192 = vector.broadcast %cst_72 : f32 to vector<8x128xf32>
    %193 = arith.addf %192, %191 : vector<8x128xf32>
    %194 = arith.divf %192, %193 : vector<8x128xf32>
    %c64_i32_73 = arith.constant 64 : i32
    %195 = tpu.dynamic_rotate %194 by %c64_i32_73 dim 1 : vector<8x128xf32>, i32 -> vector<8x128xf32>
    %196 = arith.addf %188, %13 : vector<8x128xf32>
    %197 = arith.mulf %195, %196 : vector<8x128xf32>
    %198 = arith.addf %186, %197 : vector<8x128xf32>
    %199 = math.tanh %198 : vector<8x128xf32>
    %c64_i32_74 = arith.constant 64 : i32
    %200 = tpu.dynamic_rotate %199 by %c64_i32_74 dim 1 : vector<8x128xf32>, i32 -> vector<8x128xf32>
    %c96_i32_75 = arith.constant 96 : i32
    %201 = tpu.dynamic_rotate %194 by %c96_i32_75 dim 1 : vector<8x128xf32>, i32 -> vector<8x128xf32>
    %cst_76 = arith.constant 1.000000e+00 : f32
    %202 = vector.broadcast %cst_76 : f32 to vector<8x128xf32>
    %203 = arith.subf %202, %201 : vector<8x128xf32>
    %204 = arith.mulf %203, %200 : vector<8x128xf32>
    %205 = arith.mulf %201, %180 : vector<8x128xf32>
    %206 = arith.addf %204, %205 : vector<8x128xf32>
    %cst_77 = arith.constant 0.000000e+00 : f32
    %207 = vector.broadcast %cst_77 : f32 to vector<8x128xf32>
    %208 = arith.select %2, %206, %207 : vector<8x128xi1>, vector<8x128xf32>
    %209 = arith.index_cast %184 : i32 to index
    %c0_78 = arith.constant 0 : index
    %210 = vector.load %arg13[%209, %c0_78] : memref<64x128xf32, #tpu.memory_space<vmem>>, vector<8x128xf32>
    tpu.vector_store %arg13[%209, %c0_78], %208 {strides = array<i32>} : memref<64x128xf32, #tpu.memory_space<vmem>>, vector<8x128xf32>,
    %c7_i32 = arith.constant 7 : i32
    %c8_i32_79 = arith.constant 8 : i32
    %211 = arith.muli %c7_i32, %c8_i32_79 : i32
    %212 = tpu.assume_multiple %211, 8 : i32
    %213 = arith.index_cast %212 : i32 to index
    %c0_80 = arith.constant 0 : index
    %214 = vector.load %arg12[%213, %c0_80] : memref<64x128xf32, #tpu.memory_space<vmem>>, vector<8x128xf32>
    %215 = arith.truncf %208 : vector<8x128xf32> to vector<8x128xbf16>
    %cst_81 = arith.constant dense<0.000000e+00> : vector<8x128xf32>
    %216 = tpu.matmul %215, %4, %cst_81 {dimension_numbers = #tpu.dot_dimension_numbers<[1], [0], [0], [1], [0, 0, 1, 1], [], []>} : vector<8x128xbf16>, vector<128x128xbf16>, vector<8x128xf32> -> vector<8x128xf32>
    %217 = arith.addf %214, %216 : vector<8x128xf32>
    %218 = arith.negf %217 : vector<8x128xf32>
    %219 = math.exp %218 : vector<8x128xf32>
    %cst_82 = arith.constant 1.000000e+00 : f32
    %220 = vector.broadcast %cst_82 : f32 to vector<8x128xf32>
    %221 = arith.addf %220, %219 : vector<8x128xf32>
    %222 = arith.divf %220, %221 : vector<8x128xf32>
    %c64_i32_83 = arith.constant 64 : i32
    %223 = tpu.dynamic_rotate %222 by %c64_i32_83 dim 1 : vector<8x128xf32>, i32 -> vector<8x128xf32>
    %224 = arith.addf %216, %13 : vector<8x128xf32>
    %225 = arith.mulf %223, %224 : vector<8x128xf32>
    %226 = arith.addf %214, %225 : vector<8x128xf32>
    %227 = math.tanh %226 : vector<8x128xf32>
    %c64_i32_84 = arith.constant 64 : i32
    %228 = tpu.dynamic_rotate %227 by %c64_i32_84 dim 1 : vector<8x128xf32>, i32 -> vector<8x128xf32>
    %c96_i32_85 = arith.constant 96 : i32
    %229 = tpu.dynamic_rotate %222 by %c96_i32_85 dim 1 : vector<8x128xf32>, i32 -> vector<8x128xf32>
    %cst_86 = arith.constant 1.000000e+00 : f32
    %230 = vector.broadcast %cst_86 : f32 to vector<8x128xf32>
    %231 = arith.subf %230, %229 : vector<8x128xf32>
    %232 = arith.mulf %231, %228 : vector<8x128xf32>
    %233 = arith.mulf %229, %208 : vector<8x128xf32>
    %234 = arith.addf %232, %233 : vector<8x128xf32>
    %cst_87 = arith.constant 0.000000e+00 : f32
    %235 = vector.broadcast %cst_87 : f32 to vector<8x128xf32>
    %236 = arith.select %2, %234, %235 : vector<8x128xi1>, vector<8x128xf32>
    %237 = arith.index_cast %212 : i32 to index
    %c0_88 = arith.constant 0 : index
    %238 = vector.load %arg13[%237, %c0_88] : memref<64x128xf32, #tpu.memory_space<vmem>>, vector<8x128xf32>
    tpu.vector_store %arg13[%237, %c0_88], %236 {strides = array<i32>} : memref<64x128xf32, #tpu.memory_space<vmem>>, vector<8x128xf32>,
    %c8_i32_89 = arith.constant 8 : i32
    %c0_90 = arith.constant 0 : index
    %c0_91 = arith.constant 0 : index
    %239 = vector.load %arg5[%c0_90, %c0_91] : memref<128x128xbf16, #tpu.memory_space<vmem>>, vector<128x128xbf16>
    %c0_92 = arith.constant 0 : index
    %c0_93 = arith.constant 0 : index
    %240 = vector.load %arg6[%c0_92, %c0_93] : memref<128x128xbf16, #tpu.memory_space<vmem>>, vector<128x128xbf16>
    %c0_94 = arith.constant 0 : index
    %c0_95 = arith.constant 0 : index
    %241 = vector.load %arg7[%c0_94, %c0_95] : memref<1x128xf32, #tpu.memory_space<vmem>>, vector<1x128xf32>
    %c0_96 = arith.constant 0 : index
    %c0_97 = arith.constant 0 : index
    %242 = vector.load %arg8[%c0_96, %c0_97] : memref<1x128xf32, #tpu.memory_space<vmem>>, vector<1x128xf32>
    %c0_98 = arith.constant 0 : index
    %c0_99 = arith.constant 0 : index
    %243 = vector.load %arg13[%c0_98, %c0_99] : memref<64x128xf32, #tpu.memory_space<vmem>>, vector<64x128xf32>
    %244 = arith.truncf %243 : vector<64x128xf32> to vector<64x128xbf16>
    %cst_100 = arith.constant dense<0.000000e+00> : vector<64x128xf32>
    %245 = tpu.matmul %244, %239, %cst_100 {dimension_numbers = #tpu.dot_dimension_numbers<[1], [0], [0], [1], [0, 0, 1, 1], [], []>} : vector<64x128xbf16>, vector<128x128xbf16>, vector<64x128xf32> -> vector<64x128xf32>
    %246 = vector.broadcast %241 : vector<1x128xf32> to vector<64x128xf32>
    %247 = arith.addf %245, %246 : vector<64x128xf32>
    %c0_101 = arith.constant 0 : index
    %c0_102 = arith.constant 0 : index
    %248 = vector.load %arg12[%c0_101, %c0_102] : memref<64x128xf32, #tpu.memory_space<vmem>>, vector<64x128xf32>
    tpu.vector_store %arg12[%c0_101, %c0_102], %247 {strides = array<i32>} : memref<64x128xf32, #tpu.memory_space<vmem>>, vector<64x128xf32>,
    %249 = vector.shape_cast %242 : vector<1x128xf32> to vector<1x128xf32>
    %250 = vector.broadcast %249 : vector<1x128xf32> to vector<8x128xf32>
    %cst_103 = arith.constant 0.000000e+00 : f32
    %251 = vector.broadcast %cst_103 : f32 to vector<8x128xf32>
    %c0_i32_104 = arith.constant 0 : i32
    %c8_i32_105 = arith.constant 8 : i32
    %252 = arith.muli %c0_i32_104, %c8_i32_105 : i32
    %253 = tpu.assume_multiple %252, 8 : i32
    %254 = arith.index_cast %253 : i32 to index
    %c0_106 = arith.constant 0 : index
    %255 = vector.load %arg12[%254, %c0_106] : memref<64x128xf32, #tpu.memory_space<vmem>>, vector<8x128xf32>
    %256 = arith.truncf %251 : vector<8x128xf32> to vector<8x128xbf16>
    %cst_107 = arith.constant dense<0.000000e+00> : vector<8x128xf32>
    %257 = tpu.matmul %256, %240, %cst_107 {dimension_numbers = #tpu.dot_dimension_numbers<[1], [0], [0], [1], [0, 0, 1, 1], [], []>} : vector<8x128xbf16>, vector<128x128xbf16>, vector<8x128xf32> -> vector<8x128xf32>
    %258 = arith.addf %255, %257 : vector<8x128xf32>
    %259 = arith.negf %258 : vector<8x128xf32>
    %260 = math.exp %259 : vector<8x128xf32>
    %cst_108 = arith.constant 1.000000e+00 : f32
    %261 = vector.broadcast %cst_108 : f32 to vector<8x128xf32>
    %262 = arith.addf %261, %260 : vector<8x128xf32>
    %263 = arith.divf %261, %262 : vector<8x128xf32>
    %c64_i32_109 = arith.constant 64 : i32
    %264 = tpu.dynamic_rotate %263 by %c64_i32_109 dim 1 : vector<8x128xf32>, i32 -> vector<8x128xf32>
    %265 = arith.addf %257, %250 : vector<8x128xf32>
    %266 = arith.mulf %264, %265 : vector<8x128xf32>
    %267 = arith.addf %255, %266 : vector<8x128xf32>
    %268 = math.tanh %267 : vector<8x128xf32>
    %c64_i32_110 = arith.constant 64 : i32
    %269 = tpu.dynamic_rotate %268 by %c64_i32_110 dim 1 : vector<8x128xf32>, i32 -> vector<8x128xf32>
    %c96_i32_111 = arith.constant 96 : i32
    %270 = tpu.dynamic_rotate %263 by %c96_i32_111 dim 1 : vector<8x128xf32>, i32 -> vector<8x128xf32>
    %cst_112 = arith.constant 1.000000e+00 : f32
    %271 = vector.broadcast %cst_112 : f32 to vector<8x128xf32>
    %272 = arith.subf %271, %270 : vector<8x128xf32>
    %273 = arith.mulf %272, %269 : vector<8x128xf32>
    %274 = arith.mulf %270, %251 : vector<8x128xf32>
    %275 = arith.addf %273, %274 : vector<8x128xf32>
    %cst_113 = arith.constant 0.000000e+00 : f32
    %276 = vector.broadcast %cst_113 : f32 to vector<8x128xf32>
    %277 = arith.select %2, %275, %276 : vector<8x128xi1>, vector<8x128xf32>
    %c1_i32_114 = arith.constant 1 : i32
    %c8_i32_115 = arith.constant 8 : i32
    %278 = arith.muli %c1_i32_114, %c8_i32_115 : i32
    %279 = tpu.assume_multiple %278, 8 : i32
    %280 = arith.index_cast %279 : i32 to index
    %c0_116 = arith.constant 0 : index
    %281 = vector.load %arg12[%280, %c0_116] : memref<64x128xf32, #tpu.memory_space<vmem>>, vector<8x128xf32>
    %282 = arith.truncf %277 : vector<8x128xf32> to vector<8x128xbf16>
    %cst_117 = arith.constant dense<0.000000e+00> : vector<8x128xf32>
    %283 = tpu.matmul %282, %240, %cst_117 {dimension_numbers = #tpu.dot_dimension_numbers<[1], [0], [0], [1], [0, 0, 1, 1], [], []>} : vector<8x128xbf16>, vector<128x128xbf16>, vector<8x128xf32> -> vector<8x128xf32>
    %284 = arith.addf %281, %283 : vector<8x128xf32>
    %285 = arith.negf %284 : vector<8x128xf32>
    %286 = math.exp %285 : vector<8x128xf32>
    %cst_118 = arith.constant 1.000000e+00 : f32
    %287 = vector.broadcast %cst_118 : f32 to vector<8x128xf32>
    %288 = arith.addf %287, %286 : vector<8x128xf32>
    %289 = arith.divf %287, %288 : vector<8x128xf32>
    %c64_i32_119 = arith.constant 64 : i32
    %290 = tpu.dynamic_rotate %289 by %c64_i32_119 dim 1 : vector<8x128xf32>, i32 -> vector<8x128xf32>
    %291 = arith.addf %283, %250 : vector<8x128xf32>
    %292 = arith.mulf %290, %291 : vector<8x128xf32>
    %293 = arith.addf %281, %292 : vector<8x128xf32>
    %294 = math.tanh %293 : vector<8x128xf32>
    %c64_i32_120 = arith.constant 64 : i32
    %295 = tpu.dynamic_rotate %294 by %c64_i32_120 dim 1 : vector<8x128xf32>, i32 -> vector<8x128xf32>
    %c96_i32_121 = arith.constant 96 : i32
    %296 = tpu.dynamic_rotate %289 by %c96_i32_121 dim 1 : vector<8x128xf32>, i32 -> vector<8x128xf32>
    %cst_122 = arith.constant 1.000000e+00 : f32
    %297 = vector.broadcast %cst_122 : f32 to vector<8x128xf32>
    %298 = arith.subf %297, %296 : vector<8x128xf32>
    %299 = arith.mulf %298, %295 : vector<8x128xf32>
    %300 = arith.mulf %296, %277 : vector<8x128xf32>
    %301 = arith.addf %299, %300 : vector<8x128xf32>
    %cst_123 = arith.constant 0.000000e+00 : f32
    %302 = vector.broadcast %cst_123 : f32 to vector<8x128xf32>
    %303 = arith.select %2, %301, %302 : vector<8x128xi1>, vector<8x128xf32>
    %c2_i32_124 = arith.constant 2 : i32
    %c8_i32_125 = arith.constant 8 : i32
    %304 = arith.muli %c2_i32_124, %c8_i32_125 : i32
    %305 = tpu.assume_multiple %304, 8 : i32
    %306 = arith.index_cast %305 : i32 to index
    %c0_126 = arith.constant 0 : index
    %307 = vector.load %arg12[%306, %c0_126] : memref<64x128xf32, #tpu.memory_space<vmem>>, vector<8x128xf32>
    %308 = arith.truncf %303 : vector<8x128xf32> to vector<8x128xbf16>
    %cst_127 = arith.constant dense<0.000000e+00> : vector<8x128xf32>
    %309 = tpu.matmul %308, %240, %cst_127 {dimension_numbers = #tpu.dot_dimension_numbers<[1], [0], [0], [1], [0, 0, 1, 1], [], []>} : vector<8x128xbf16>, vector<128x128xbf16>, vector<8x128xf32> -> vector<8x128xf32>
    %310 = arith.addf %307, %309 : vector<8x128xf32>
    %311 = arith.negf %310 : vector<8x128xf32>
    %312 = math.exp %311 : vector<8x128xf32>
    %cst_128 = arith.constant 1.000000e+00 : f32
    %313 = vector.broadcast %cst_128 : f32 to vector<8x128xf32>
    %314 = arith.addf %313, %312 : vector<8x128xf32>
    %315 = arith.divf %313, %314 : vector<8x128xf32>
    %c64_i32_129 = arith.constant 64 : i32
    %316 = tpu.dynamic_rotate %315 by %c64_i32_129 dim 1 : vector<8x128xf32>, i32 -> vector<8x128xf32>
    %317 = arith.addf %309, %250 : vector<8x128xf32>
    %318 = arith.mulf %316, %317 : vector<8x128xf32>
    %319 = arith.addf %307, %318 : vector<8x128xf32>
    %320 = math.tanh %319 : vector<8x128xf32>
    %c64_i32_130 = arith.constant 64 : i32
    %321 = tpu.dynamic_rotate %320 by %c64_i32_130 dim 1 : vector<8x128xf32>, i32 -> vector<8x128xf32>
    %c96_i32_131 = arith.constant 96 : i32
    %322 = tpu.dynamic_rotate %315 by %c96_i32_131 dim 1 : vector<8x128xf32>, i32 -> vector<8x128xf32>
    %cst_132 = arith.constant 1.000000e+00 : f32
    %323 = vector.broadcast %cst_132 : f32 to vector<8x128xf32>
    %324 = arith.subf %323, %322 : vector<8x128xf32>
    %325 = arith.mulf %324, %321 : vector<8x128xf32>
    %326 = arith.mulf %322, %303 : vector<8x128xf32>
    %327 = arith.addf %325, %326 : vector<8x128xf32>
    %cst_133 = arith.constant 0.000000e+00 : f32
    %328 = vector.broadcast %cst_133 : f32 to vector<8x128xf32>
    %329 = arith.select %2, %327, %328 : vector<8x128xi1>, vector<8x128xf32>
    %c3_i32_134 = arith.constant 3 : i32
    %c8_i32_135 = arith.constant 8 : i32
    %330 = arith.muli %c3_i32_134, %c8_i32_135 : i32
    %331 = tpu.assume_multiple %330, 8 : i32
    %332 = arith.index_cast %331 : i32 to index
    %c0_136 = arith.constant 0 : index
    %333 = vector.load %arg12[%332, %c0_136] : memref<64x128xf32, #tpu.memory_space<vmem>>, vector<8x128xf32>
    %334 = arith.truncf %329 : vector<8x128xf32> to vector<8x128xbf16>
    %cst_137 = arith.constant dense<0.000000e+00> : vector<8x128xf32>
    %335 = tpu.matmul %334, %240, %cst_137 {dimension_numbers = #tpu.dot_dimension_numbers<[1], [0], [0], [1], [0, 0, 1, 1], [], []>} : vector<8x128xbf16>, vector<128x128xbf16>, vector<8x128xf32> -> vector<8x128xf32>
    %336 = arith.addf %333, %335 : vector<8x128xf32>
    %337 = arith.negf %336 : vector<8x128xf32>
    %338 = math.exp %337 : vector<8x128xf32>
    %cst_138 = arith.constant 1.000000e+00 : f32
    %339 = vector.broadcast %cst_138 : f32 to vector<8x128xf32>
    %340 = arith.addf %339, %338 : vector<8x128xf32>
    %341 = arith.divf %339, %340 : vector<8x128xf32>
    %c64_i32_139 = arith.constant 64 : i32
    %342 = tpu.dynamic_rotate %341 by %c64_i32_139 dim 1 : vector<8x128xf32>, i32 -> vector<8x128xf32>
    %343 = arith.addf %335, %250 : vector<8x128xf32>
    %344 = arith.mulf %342, %343 : vector<8x128xf32>
    %345 = arith.addf %333, %344 : vector<8x128xf32>
    %346 = math.tanh %345 : vector<8x128xf32>
    %c64_i32_140 = arith.constant 64 : i32
    %347 = tpu.dynamic_rotate %346 by %c64_i32_140 dim 1 : vector<8x128xf32>, i32 -> vector<8x128xf32>
    %c96_i32_141 = arith.constant 96 : i32
    %348 = tpu.dynamic_rotate %341 by %c96_i32_141 dim 1 : vector<8x128xf32>, i32 -> vector<8x128xf32>
    %cst_142 = arith.constant 1.000000e+00 : f32
    %349 = vector.broadcast %cst_142 : f32 to vector<8x128xf32>
    %350 = arith.subf %349, %348 : vector<8x128xf32>
    %351 = arith.mulf %350, %347 : vector<8x128xf32>
    %352 = arith.mulf %348, %329 : vector<8x128xf32>
    %353 = arith.addf %351, %352 : vector<8x128xf32>
    %cst_143 = arith.constant 0.000000e+00 : f32
    %354 = vector.broadcast %cst_143 : f32 to vector<8x128xf32>
    %355 = arith.select %2, %353, %354 : vector<8x128xi1>, vector<8x128xf32>
    %c4_i32_144 = arith.constant 4 : i32
    %c8_i32_145 = arith.constant 8 : i32
    %356 = arith.muli %c4_i32_144, %c8_i32_145 : i32
    %357 = tpu.assume_multiple %356, 8 : i32
    %358 = arith.index_cast %357 : i32 to index
    %c0_146 = arith.constant 0 : index
    %359 = vector.load %arg12[%358, %c0_146] : memref<64x128xf32, #tpu.memory_space<vmem>>, vector<8x128xf32>
    %360 = arith.truncf %355 : vector<8x128xf32> to vector<8x128xbf16>
    %cst_147 = arith.constant dense<0.000000e+00> : vector<8x128xf32>
    %361 = tpu.matmul %360, %240, %cst_147 {dimension_numbers = #tpu.dot_dimension_numbers<[1], [0], [0], [1], [0, 0, 1, 1], [], []>} : vector<8x128xbf16>, vector<128x128xbf16>, vector<8x128xf32> -> vector<8x128xf32>
    %362 = arith.addf %359, %361 : vector<8x128xf32>
    %363 = arith.negf %362 : vector<8x128xf32>
    %364 = math.exp %363 : vector<8x128xf32>
    %cst_148 = arith.constant 1.000000e+00 : f32
    %365 = vector.broadcast %cst_148 : f32 to vector<8x128xf32>
    %366 = arith.addf %365, %364 : vector<8x128xf32>
    %367 = arith.divf %365, %366 : vector<8x128xf32>
    %c64_i32_149 = arith.constant 64 : i32
    %368 = tpu.dynamic_rotate %367 by %c64_i32_149 dim 1 : vector<8x128xf32>, i32 -> vector<8x128xf32>
    %369 = arith.addf %361, %250 : vector<8x128xf32>
    %370 = arith.mulf %368, %369 : vector<8x128xf32>
    %371 = arith.addf %359, %370 : vector<8x128xf32>
    %372 = math.tanh %371 : vector<8x128xf32>
    %c64_i32_150 = arith.constant 64 : i32
    %373 = tpu.dynamic_rotate %372 by %c64_i32_150 dim 1 : vector<8x128xf32>, i32 -> vector<8x128xf32>
    %c96_i32_151 = arith.constant 96 : i32
    %374 = tpu.dynamic_rotate %367 by %c96_i32_151 dim 1 : vector<8x128xf32>, i32 -> vector<8x128xf32>
    %cst_152 = arith.constant 1.000000e+00 : f32
    %375 = vector.broadcast %cst_152 : f32 to vector<8x128xf32>
    %376 = arith.subf %375, %374 : vector<8x128xf32>
    %377 = arith.mulf %376, %373 : vector<8x128xf32>
    %378 = arith.mulf %374, %355 : vector<8x128xf32>
    %379 = arith.addf %377, %378 : vector<8x128xf32>
    %cst_153 = arith.constant 0.000000e+00 : f32
    %380 = vector.broadcast %cst_153 : f32 to vector<8x128xf32>
    %381 = arith.select %2, %379, %380 : vector<8x128xi1>, vector<8x128xf32>
    %c5_i32_154 = arith.constant 5 : i32
    %c8_i32_155 = arith.constant 8 : i32
    %382 = arith.muli %c5_i32_154, %c8_i32_155 : i32
    %383 = tpu.assume_multiple %382, 8 : i32
    %384 = arith.index_cast %383 : i32 to index
    %c0_156 = arith.constant 0 : index
    %385 = vector.load %arg12[%384, %c0_156] : memref<64x128xf32, #tpu.memory_space<vmem>>, vector<8x128xf32>
    %386 = arith.truncf %381 : vector<8x128xf32> to vector<8x128xbf16>
    %cst_157 = arith.constant dense<0.000000e+00> : vector<8x128xf32>
    %387 = tpu.matmul %386, %240, %cst_157 {dimension_numbers = #tpu.dot_dimension_numbers<[1], [0], [0], [1], [0, 0, 1, 1], [], []>} : vector<8x128xbf16>, vector<128x128xbf16>, vector<8x128xf32> -> vector<8x128xf32>
    %388 = arith.addf %385, %387 : vector<8x128xf32>
    %389 = arith.negf %388 : vector<8x128xf32>
    %390 = math.exp %389 : vector<8x128xf32>
    %cst_158 = arith.constant 1.000000e+00 : f32
    %391 = vector.broadcast %cst_158 : f32 to vector<8x128xf32>
    %392 = arith.addf %391, %390 : vector<8x128xf32>
    %393 = arith.divf %391, %392 : vector<8x128xf32>
    %c64_i32_159 = arith.constant 64 : i32
    %394 = tpu.dynamic_rotate %393 by %c64_i32_159 dim 1 : vector<8x128xf32>, i32 -> vector<8x128xf32>
    %395 = arith.addf %387, %250 : vector<8x128xf32>
    %396 = arith.mulf %394, %395 : vector<8x128xf32>
    %397 = arith.addf %385, %396 : vector<8x128xf32>
    %398 = math.tanh %397 : vector<8x128xf32>
    %c64_i32_160 = arith.constant 64 : i32
    %399 = tpu.dynamic_rotate %398 by %c64_i32_160 dim 1 : vector<8x128xf32>, i32 -> vector<8x128xf32>
    %c96_i32_161 = arith.constant 96 : i32
    %400 = tpu.dynamic_rotate %393 by %c96_i32_161 dim 1 : vector<8x128xf32>, i32 -> vector<8x128xf32>
    %cst_162 = arith.constant 1.000000e+00 : f32
    %401 = vector.broadcast %cst_162 : f32 to vector<8x128xf32>
    %402 = arith.subf %401, %400 : vector<8x128xf32>
    %403 = arith.mulf %402, %399 : vector<8x128xf32>
    %404 = arith.mulf %400, %381 : vector<8x128xf32>
    %405 = arith.addf %403, %404 : vector<8x128xf32>
    %cst_163 = arith.constant 0.000000e+00 : f32
    %406 = vector.broadcast %cst_163 : f32 to vector<8x128xf32>
    %407 = arith.select %2, %405, %406 : vector<8x128xi1>, vector<8x128xf32>
    %c6_i32_164 = arith.constant 6 : i32
    %c8_i32_165 = arith.constant 8 : i32
    %408 = arith.muli %c6_i32_164, %c8_i32_165 : i32
    %409 = tpu.assume_multiple %408, 8 : i32
    %410 = arith.index_cast %409 : i32 to index
    %c0_166 = arith.constant 0 : index
    %411 = vector.load %arg12[%410, %c0_166] : memref<64x128xf32, #tpu.memory_space<vmem>>, vector<8x128xf32>
    %412 = arith.truncf %407 : vector<8x128xf32> to vector<8x128xbf16>
    %cst_167 = arith.constant dense<0.000000e+00> : vector<8x128xf32>
    %413 = tpu.matmul %412, %240, %cst_167 {dimension_numbers = #tpu.dot_dimension_numbers<[1], [0], [0], [1], [0, 0, 1, 1], [], []>} : vector<8x128xbf16>, vector<128x128xbf16>, vector<8x128xf32> -> vector<8x128xf32>
    %414 = arith.addf %411, %413 : vector<8x128xf32>
    %415 = arith.negf %414 : vector<8x128xf32>
    %416 = math.exp %415 : vector<8x128xf32>
    %cst_168 = arith.constant 1.000000e+00 : f32
    %417 = vector.broadcast %cst_168 : f32 to vector<8x128xf32>
    %418 = arith.addf %417, %416 : vector<8x128xf32>
    %419 = arith.divf %417, %418 : vector<8x128xf32>
    %c64_i32_169 = arith.constant 64 : i32
    %420 = tpu.dynamic_rotate %419 by %c64_i32_169 dim 1 : vector<8x128xf32>, i32 -> vector<8x128xf32>
    %421 = arith.addf %413, %250 : vector<8x128xf32>
    %422 = arith.mulf %420, %421 : vector<8x128xf32>
    %423 = arith.addf %411, %422 : vector<8x128xf32>
    %424 = math.tanh %423 : vector<8x128xf32>
    %c64_i32_170 = arith.constant 64 : i32
    %425 = tpu.dynamic_rotate %424 by %c64_i32_170 dim 1 : vector<8x128xf32>, i32 -> vector<8x128xf32>
    %c96_i32_171 = arith.constant 96 : i32
    %426 = tpu.dynamic_rotate %419 by %c96_i32_171 dim 1 : vector<8x128xf32>, i32 -> vector<8x128xf32>
    %cst_172 = arith.constant 1.000000e+00 : f32
    %427 = vector.broadcast %cst_172 : f32 to vector<8x128xf32>
    %428 = arith.subf %427, %426 : vector<8x128xf32>
    %429 = arith.mulf %428, %425 : vector<8x128xf32>
    %430 = arith.mulf %426, %407 : vector<8x128xf32>
    %431 = arith.addf %429, %430 : vector<8x128xf32>
    %cst_173 = arith.constant 0.000000e+00 : f32
    %432 = vector.broadcast %cst_173 : f32 to vector<8x128xf32>
    %433 = arith.select %2, %431, %432 : vector<8x128xi1>, vector<8x128xf32>
    %c7_i32_174 = arith.constant 7 : i32
    %c8_i32_175 = arith.constant 8 : i32
    %434 = arith.muli %c7_i32_174, %c8_i32_175 : i32
    %435 = tpu.assume_multiple %434, 8 : i32
    %436 = arith.index_cast %435 : i32 to index
    %c0_176 = arith.constant 0 : index
    %437 = vector.load %arg12[%436, %c0_176] : memref<64x128xf32, #tpu.memory_space<vmem>>, vector<8x128xf32>
    %438 = arith.truncf %433 : vector<8x128xf32> to vector<8x128xbf16>
    %cst_177 = arith.constant dense<0.000000e+00> : vector<8x128xf32>
    %439 = tpu.matmul %438, %240, %cst_177 {dimension_numbers = #tpu.dot_dimension_numbers<[1], [0], [0], [1], [0, 0, 1, 1], [], []>} : vector<8x128xbf16>, vector<128x128xbf16>, vector<8x128xf32> -> vector<8x128xf32>
    %440 = arith.addf %437, %439 : vector<8x128xf32>
    %441 = arith.negf %440 : vector<8x128xf32>
    %442 = math.exp %441 : vector<8x128xf32>
    %cst_178 = arith.constant 1.000000e+00 : f32
    %443 = vector.broadcast %cst_178 : f32 to vector<8x128xf32>
    %444 = arith.addf %443, %442 : vector<8x128xf32>
    %445 = arith.divf %443, %444 : vector<8x128xf32>
    %c64_i32_179 = arith.constant 64 : i32
    %446 = tpu.dynamic_rotate %445 by %c64_i32_179 dim 1 : vector<8x128xf32>, i32 -> vector<8x128xf32>
    %447 = arith.addf %439, %250 : vector<8x128xf32>
    %448 = arith.mulf %446, %447 : vector<8x128xf32>
    %449 = arith.addf %437, %448 : vector<8x128xf32>
    %450 = math.tanh %449 : vector<8x128xf32>
    %c64_i32_180 = arith.constant 64 : i32
    %451 = tpu.dynamic_rotate %450 by %c64_i32_180 dim 1 : vector<8x128xf32>, i32 -> vector<8x128xf32>
    %c96_i32_181 = arith.constant 96 : i32
    %452 = tpu.dynamic_rotate %445 by %c96_i32_181 dim 1 : vector<8x128xf32>, i32 -> vector<8x128xf32>
    %cst_182 = arith.constant 1.000000e+00 : f32
    %453 = vector.broadcast %cst_182 : f32 to vector<8x128xf32>
    %454 = arith.subf %453, %452 : vector<8x128xf32>
    %455 = arith.mulf %454, %451 : vector<8x128xf32>
    %456 = arith.mulf %452, %433 : vector<8x128xf32>
    %457 = arith.addf %455, %456 : vector<8x128xf32>
    %cst_183 = arith.constant 0.000000e+00 : f32
    %458 = vector.broadcast %cst_183 : f32 to vector<8x128xf32>
    %459 = arith.select %2, %457, %458 : vector<8x128xi1>, vector<8x128xf32>
    %c8_i32_184 = arith.constant 8 : i32
    %460 = arith.truncf %459 : vector<8x128xf32> to vector<8x128xbf16>
    %c0_185 = arith.constant 0 : index
    %c0_186 = arith.constant 0 : index
    %461 = vector.load %arg9[%c0_185, %c0_186] : memref<128x128xbf16, #tpu.memory_space<vmem>>, vector<128x128xbf16>
    %cst_187 = arith.constant dense<0.000000e+00> : vector<8x128xf32>
    %462 = tpu.matmul %460, %461, %cst_187 {dimension_numbers = #tpu.dot_dimension_numbers<[1], [0], [0], [1], [0, 0, 1, 1], [], []>} : vector<8x128xbf16>, vector<128x128xbf16>, vector<8x128xf32> -> vector<8x128xf32>
    %c0_188 = arith.constant 0 : index
    %c0_189 = arith.constant 0 : index
    %463 = vector.load %arg10[%c0_188, %c0_189] : memref<1x128xf32, #tpu.memory_space<vmem>>, vector<1x128xf32>
    %464 = vector.broadcast %463 : vector<1x128xf32> to vector<8x128xf32>
    %465 = arith.addf %462, %464 : vector<8x128xf32>
    %c0_190 = arith.constant 0 : index
    %c0_191 = arith.constant 0 : index
    %466 = vector.load %arg11[%c0_190, %c0_191] : memref<8x128xf32, #tpu.memory_space<vmem>>, vector<8x128xf32>
    tpu.vector_store %arg11[%c0_190, %c0_191], %465 {strides = array<i32>} : memref<8x128xf32, #tpu.memory_space<vmem>>, vector<8x128xf32>,
    return
  }
}

</mosaic_0001>

<bundles_post_ra>
// kernel: tpu_custom_call.1
= control target key start
LH: loop header
LB: loop body
LE: loop exit
PB: predicated region body
PF: predicated region fallthrough
CT: control target
= control target key end

     0   :  { %16 = vsyncpa [#allocation5], 0  ;;  %s3465_s0 = inlined_call_operand.hbm [shape: bf16[64,128], index: 0, kind: input, shape index: {}]   ;;  %s3466_s1 = inlined_call_operand.hbm [shape: bf16[128,128], index: 1, kind: input, shape index: {}]   ;;  %s3467_s2 = inlined_call_operand.hbm [shape: bf16[128,128], index: 2, kind: input, shape index: {}]   ;;  %s3468_s3 = inlined_call_operand.vmem [shape: f32[1,128], index: 3, kind: input, shape index: {}]   ;;  %s3469_s4 = inlined_call_operand.vmem [shape: f32[1,128], index: 4, kind: input, shape index: {}]   ;;  %s3470_s5 = inlined_call_operand.hbm [shape: bf16[128,128], index: 5, kind: input, shape index: {}]   ;;  %s3471_s6 = inlined_call_operand.hbm [shape: bf16[128,128], index: 6, kind: input, shape index: {}]   ;;  %s3472_s7 = inlined_call_operand.vmem [shape: f32[1,128], index: 7, kind: input, shape index: {}]   ;;  %s3473_s8 = inlined_call_operand.vmem [shape: f32[1,128], index: 8, kind: input, shape index: {}]   ;;  %s3474_s9 = inlined_call_operand.hbm [shape: bf16[128,128], index: 9, kind: input, shape index: {}]   ;;  %s3475_s10 = inlined_call_operand.vmem [shape: f32[1,128], index: 10, kind: input, shape index: {}]   ;;  %s3476_s11 = inlined_call_operand.hbm [shape: f32[8,128], index: 11, kind: output, shape index: {}]  }
   0x1   :  { %17 = vsyncpa [#allocation8], 0 }
   0x2   :  { %18 = vsyncpa [#allocation11], 0 }
   0x3   :  { %19 = vsyncpa [#allocation14], 0 }
   0x4   :  { %20 = vsyncpa [#allocation6], 0  ;;  %s2764_s17 = smov [#allocation7]   ;;  %s2765_s19 = smov [#allocation10]  }
   0x5   :  { %s38_s18 = sshll.u32 %s2764_s17, 4  ;;  %s66_s20 = sshll.u32 %s2765_s19, 4  ;;  %s39_s18 = int_to_ptr.vmem [resolvable:$true] %s38_s18  ;;  %s67_s20 = int_to_ptr.vmem [resolvable:$true] %s66_s20 }
   0x6   :  { %s2622_s21 = scalar_lea.vmem %s39_s18, 1024  ;;  %p2627_p1 = scmp.lt.s32.totalorder %s39_s18, %s39_s18 }
   0x7   :  { %p2623_p0 = scmp.ne.s32.totalorder %s39_s18, %s2622_s21  ;;  %p2628_p2 = scmp.lt.s32.totalorder %s2622_s21, %s2622_s21 }
   0x9   :  { %p2629_p3 = por %p2628_p2, %p2627_p1 }
   0xb   :  { %p2630_p4 = pnand %p2629_p3, %p2623_p0 }
   0xd   :  { %2633 = shalt.err (!%p2630_p4)
}
   0xe   :  { %s2766_s22 = smov 64   ;;  %s2767_s23 = smov 4  }
   0xf   :  { %44 = dma.hbm_to_vmem [thread:$0]  %s3466_s1, 1024, %s39_s18, [#allocation8], %s2766_s22, %s2766_s22, %s2767_s23  }
  0x10   :  { %s2642_s26 = scalar_lea.vmem %s67_s20, 1024  ;;  %p2647_p6 = scmp.lt.s32.totalorder %s67_s20, %s67_s20 }
  0x11   :  { %p2643_p5 = scmp.ne.s32.totalorder %s67_s20, %s2642_s26  ;;  %p2648_p7 = scmp.lt.s32.totalorder %s2642_s26, %s2642_s26 }
  0x13   :  { %p2649_p8 = por %p2648_p7, %p2647_p6 }
  0x15   :  { %p2650_p9 = pnand %p2649_p8, %p2643_p5 }
  0x17   :  { %2653 = shalt.err (!%p2650_p9)
}
  0x18   :  { %72 = dma.hbm_to_vmem [thread:$0]  %s3470_s5, 1024, %s67_s20, [#allocation11], %s2766_s22, %s2766_s22, %s2767_s23  }
  0x19   :  { %s2768_s29 = smov [#allocation4]   ;;  %s2769_s12 = smov [#allocation9]  }
  0x1a   :  { %s26_s30 = sshll.u32 %s2768_s29, 4  ;;  %s50_s13 = sshll.u32 %s2769_s12, 4  ;;  %s27_s30 = int_to_ptr.vmem [resolvable:$true] %s26_s30  ;;  %s51_s13 = int_to_ptr.vmem [resolvable:$true] %s50_s13 }
  0x1b   :  { %s2662_s1 = scalar_lea.vmem %s27_s30, 512  ;;  %p2667_p11 = scmp.lt.s32.totalorder %s27_s30, %s27_s30 }
  0x1c   :  { %p2663_p10 = scmp.ne.s32.totalorder %s27_s30, %s2662_s1  ;;  %p2668_p12 = scmp.lt.s32.totalorder %s2662_s1, %s2662_s1 }
  0x1e   :  { %p2669_p13 = por %p2668_p12, %p2667_p11 }
  0x20   :  { %p2670_p0 = pnand %p2669_p13, %p2663_p10 }
  0x22   :  { %2673 = shalt.err (!%p2670_p0)
}
  0x23   :  { %32 = dma.hbm_to_vmem [thread:$0]  %s3465_s0, 512, %s27_s30, [#allocation5], %s2766_s22, %s2766_s22, %s2767_s23  }
  0x24   :  { %s2682_s5 = scalar_lea.vmem %s51_s13, 1024  ;;  %p2687_p2 = scmp.lt.s32.totalorder %s51_s13, %s51_s13 }
  0x25   :  { %p2683_p1 = scmp.ne.s32.totalorder %s51_s13, %s2682_s5  ;;  %p2688_p3 = scmp.lt.s32.totalorder %s2682_s5, %s2682_s5 }
  0x27   :  { %p2689_p4 = por %p2688_p3, %p2687_p2 }
  0x29   :  { %p2690_p5 = pnand %p2689_p4, %p2683_p1 }
  0x2b   :  { %2693 = shalt.err (!%p2690_p5)
}
  0x2c   :  { %56 = dma.hbm_to_vmem [thread:$0]  %s3467_s2, 1024, %s51_s13, [#allocation8], %s2766_s22, %s2766_s22, %s2767_s23  }
  0x2d   :  { %s2770_s18 = smov [#allocation12]   ;;  %s2771_s20 = smov [#allocation13]  }
  0x2e   :  { %s78_s19 = sshll.u32 %s2770_s18, 4  ;;  %s94_s21 = sshll.u32 %s2771_s20, 4  ;;  %s79_s19 = int_to_ptr.vmem [resolvable:$true] %s78_s19  ;;  %s95_s21 = int_to_ptr.vmem [resolvable:$true] %s94_s21 }
  0x2f   :  { %s2702_s0 = scalar_lea.vmem %s79_s19, 1024  ;;  %p2707_p7 = scmp.lt.s32.totalorder %s79_s19, %s79_s19 }
  0x30   :  { %p2703_p6 = scmp.ne.s32.totalorder %s79_s19, %s2702_s0  ;;  %p2708_p8 = scmp.lt.s32.totalorder %s2702_s0, %s2702_s0 }
  0x32   :  { %p2709_p9 = por %p2708_p8, %p2707_p7 }
  0x34   :  { %p2710_p10 = pnand %p2709_p9, %p2703_p6 }
  0x36   :  { %2713 = shalt.err (!%p2710_p10)
}
  0x37   :  { %84 = dma.hbm_to_vmem [thread:$0]  %s3471_s6, 1024, %s79_s19, [#allocation11], %s2766_s22, %s2766_s22, %s2767_s23  }
  0x38   :  { %s2722_s2 = scalar_lea.vmem %s95_s21, 1024  ;;  %p2727_p12 = scmp.lt.s32.totalorder %s95_s21, %s95_s21 }
  0x39   :  { %p2723_p11 = scmp.ne.s32.totalorder %s95_s21, %s2722_s2  ;;  %p2728_p13 = scmp.lt.s32.totalorder %s2722_s2, %s2722_s2 }
  0x3b   :  { %p2729_p0 = por %p2728_p13, %p2727_p12 }
  0x3d   :  { %p2730_p1 = pnand %p2729_p0, %p2723_p11 }
  0x3f   :  { %2733 = shalt.err (!%p2730_p1)
}
  0x40   :  { %100 = dma.hbm_to_vmem [thread:$0]  %s3474_s9, 1024, %s95_s21, [#allocation14], %s2766_s22, %s2766_s22, %s2767_s23  }
  0x41   :  { %2754 = dma.done.wait [#allocation5], 512  }
  0x42   :  { %2755 = vsyncadd [#allocation5], 4294966784 }
  0x43   :  { %2756 = dma.done.wait [#allocation8], 2048  }
  0x44   :  { %2757 = vsyncadd [#allocation8], 4294965248 }
  0x45   :  { %2758 = dma.done.wait [#allocation11], 2048  }
  0x46   :  { %2759 = vsyncadd [#allocation11], 4294965248 }
  0x47   :  { %2760 = dma.done.wait [#allocation14], 1024  }
  0x48   :  { %2761 = vsyncadd [#allocation14], 4294966272  ;;  %v2772_v0 = vmov 0.0   ;;  %vm2773_vm0 = vmmov 0   ;;  %v2474_v1 = vld [vmem:[#allocation7 + $0x38] sm:$0xff]   ;;  %v2476_v3 = vld [vmem:[#allocation7 + $0x30] sm:$0xff]   ;;  %v122_v41 = vlaneseq }
  0x49   :  { %2097 = vmatprep.subr.bf16.mxu1 %v2772_v0  ;;  %2113 = vmatprep.mubr.msk.bf16.mxu1 %vm2773_vm0, %v2772_v0  ;;  %v2876_v2 = vld [vmem:[#allocation9 + $0x38] sm:$0xff]   ;;  %v2879_v4 = vld [vmem:[#allocation9 + $0x30] sm:$0xff]   ;;  %v2478_v5 = vld [vmem:[#allocation7 + $0x28] sm:$0xff]   ;;  %v2774_v19 = vmov 0   ;;  %s2775_s23 = smov 96   ;;  %s2776_s13 = smov [#allocation15]  }
  0x4a   :  { %2073 = vmatprep.subr.bf16.mxu0 %v2474_v1  ;;  %2098 = vmatpush3.bf16.msra.mxu1 %v2876_v2  ;;  %v2883_v6 = vld [vmem:[#allocation9 + $0x28] sm:$0xff]   ;;  %v2480_v7 = vld [vmem:[#allocation7 + $0x20] sm:$0xff]   ;;  %v2482_v9 = vld [vmem:[#allocation7 + $0x18] sm:$0xff]   ;;  %v2963_v43 = vand.u32 127, %v122_v41  ;;  %s1762_s1 = sshll.u32 %s2776_s13, 4  ;;  %s1763_s1 = int_to_ptr.vmem [resolvable:$true] %s1762_s1 }
  0x4b   :  { %2074 = vmatpush3.bf16.msra.mxu0 %v2474_v1  ;;  %2099 = vmatprep.subr.bf16.mxu1 %v2772_v0  ;;  %v2887_v8 = vld [vmem:[#allocation9 + $0x20] sm:$0xff]   ;;  %v2890_v10 = vld [vmem:[#allocation9 + $0x18] sm:$0xff]   ;;  %v2484_v11 = vld [vmem:[#allocation7 + $0x10] sm:$0xff]   ;;  %p2739_p3 = scmp.lt.s32.totalorder %s1763_s1, %s1763_s1 }
  0x4c   :  { %2075 = vmatprep.subr.bf16.mxu0 %v2476_v3  ;;  %v2490_v12 = vld [vmem:[#allocation4] sm:$0xff]   ;;  %v2894_v13 = vld [vmem:[#allocation9 + $0x10] sm:$0xff]   ;;  %v2486_v14 = vld [vmem:[#allocation7 + $0x8] sm:$0xff]   ;;  %vm124_vm1 = vcmp.lt.s32.totalorder %v2963_v43, 32 }
  0x4d   :  { %2089 = vmatprep.mubr.bf16.mxu0 %v2490_v12  ;;  %v2898_v15 = vld [vmem:[#allocation9 + $0x8] sm:$0xff]   ;;  %v2488_v16 = vld [vmem:[#allocation7] sm:$0xff]   ;;  %v2492_v33 = vld [vmem:[#allocation4 + $0x10] sm:$0xff]  }
  0x4e   :  { %2100 = vmatpush3.bf16.msra.mxu1 %v2879_v4  ;;  %v2902_v17 = vld [vmem:[#allocation9] sm:$0xff]   ;;  %v2491_v18 = vld [vmem:[#allocation4 + $0x8] sm:$0xff]   ;;  %v2493_v34 = vld [vmem:[#allocation4 + $0x18] sm:$0xff]  }
  0x4f   :  { %2076 = vmatpush3.bf16.msra.mxu0 %v2476_v3  ;;  %2101 = vmatprep.subr.bf16.mxu1 %v2772_v0  ;;  %v2949_v22 = vld [vmem:[%s3468_s3] ss:$0 sm:$0xff]  ;;  %vm2971_vm2 = vmpackc.low %vm124_vm1, %vm124_vm1 }
  0x50   :  { %2077 = vmatprep.subr.bf16.mxu0 %v2478_v5  ;;  %v2959_v35 = vld [vmem:[%s3469_s4] ss:$0 sm:$0xff] }
  0x52   :  { %2102 = vmatpush3.bf16.msra.mxu1 %v2883_v6 }
  0x53   :  { %2078 = vmatpush3.bf16.msra.mxu0 %v2478_v5  ;;  %2103 = vmatprep.subr.bf16.mxu1 %v2772_v0 }
  0x54   :  { %2079 = vmatprep.subr.bf16.mxu0 %v2480_v7 }
  0x56   :  { %2104 = vmatpush3.bf16.msra.mxu1 %v2887_v8 }
  0x57   :  { %2080 = vmatpush3.bf16.msra.mxu0 %v2480_v7  ;;  %2105 = vmatprep.subr.bf16.mxu1 %v2772_v0 }
  0x58   :  { %2081 = vmatprep.subr.bf16.mxu0 %v2482_v9 }
  0x5a   :  { %2106 = vmatpush3.bf16.msra.mxu1 %v2890_v10 }
  0x5b   :  { %2082 = vmatpush3.bf16.msra.mxu0 %v2482_v9  ;;  %2107 = vmatprep.subr.bf16.mxu1 %v2772_v0 }
  0x5c   :  { %2083 = vmatprep.subr.bf16.mxu0 %v2484_v11 }
  0x5e   :  { %2108 = vmatpush3.bf16.msra.mxu1 %v2894_v13 }
  0x5f   :  { %2084 = vmatpush3.bf16.msra.mxu0 %v2484_v11  ;;  %2109 = vmatprep.subr.bf16.mxu1 %v2772_v0 }
  0x60   :  { %2085 = vmatprep.subr.bf16.mxu0 %v2486_v14 }
  0x62   :  { %2110 = vmatpush3.bf16.msra.mxu1 %v2898_v15 }
  0x63   :  { %2086 = vmatpush3.bf16.msra.mxu0 %v2486_v14  ;;  %2111 = vmatprep.subr.bf16.mxu1 %v2772_v0 }
  0x64   :  { %2087 = vmatprep.subr.bf16.mxu0 %v2488_v16 }
  0x66   :  { %2112 = vmatpush3.bf16.msra.mxu1 %v2902_v17 }
  0x67   :  { %2088 = vmatpush3.bf16.msra.mxu0 %v2488_v16  ;;  %2137 = vmatprep.subr.bf16.mxu1 %v2772_v0 }
  0x68   :  { %2117 = vmatprep.subr.bf16.mxu0 %v2772_v0 }
  0x69   :  { %2114 = vmatmul.mubr.bf16.vlgmr.msra.gmra.mxu1 %v2774_v19 }
  0x6a   :  { %2090 = vmatmul.mubr.bf16.vlgmr.msra.gmra.mxu0 %v2491_v18  ;;  %2138 = vmatpush3.bf16.msra.mxu1 %v2876_v2 }
  0x6b   :  { %2118 = vmatpush3.bf16.msra.mxu0 %v2876_v2  ;;  %2139 = vmatprep.subr.bf16.mxu1 %v2772_v0 }
  0x6c   :  { %2119 = vmatprep.subr.bf16.mxu0 %v2772_v0  ;;  %2153 = vmatprep.mubr.msk.bf16.mxu1 %vm2773_vm0, %v2772_v0 }
  0x6d   :  { %2093 = vmatprep.mubr.bf16.mxu0 %v2492_v33 }
  0x6e   :  { %2140 = vmatpush3.bf16.msra.mxu1 %v2879_v4 }
  0x6f   :  { %2120 = vmatpush3.bf16.msra.mxu0 %v2879_v4  ;;  %2141 = vmatprep.subr.bf16.mxu1 %v2772_v0 }
  0x70   :  { %2121 = vmatprep.subr.bf16.mxu0 %v2772_v0 }
  0x72   :  { %2142 = vmatpush3.bf16.msra.mxu1 %v2883_v6  ;;  %2094 = vmatmul.mubr.bf16.gmra.mxu0 %v2493_v34 }
  0x73   :  { %2122 = vmatpush3.bf16.msra.mxu0 %v2883_v6  ;;  %2143 = vmatprep.subr.bf16.mxu1 %v2772_v0 }
  0x74   :  { %2123 = vmatprep.subr.bf16.mxu0 %v2772_v0  ;;  %2133 = vmatprep.mubr.msk.bf16.mxu0 %vm2773_vm0, %v2772_v0 }
  0x76   :  { %2144 = vmatpush3.bf16.msra.mxu1 %v2887_v8 }
  0x77   :  { %2124 = vmatpush3.bf16.msra.mxu0 %v2887_v8  ;;  %2145 = vmatprep.subr.bf16.mxu1 %v2772_v0 }
  0x78   :  { %2125 = vmatprep.subr.bf16.mxu0 %v2772_v0 }
  0x7a   :  { %2146 = vmatpush3.bf16.msra.mxu1 %v2890_v10 }
  0x7b   :  { %2126 = vmatpush3.bf16.msra.mxu0 %v2890_v10  ;;  %2147 = vmatprep.subr.bf16.mxu1 %v2772_v0 }
  0x7c   :  { %2127 = vmatprep.subr.bf16.mxu0 %v2772_v0 }
  0x7e   :  { %2148 = vmatpush3.bf16.msra.mxu1 %v2894_v13 }
  0x7f   :  { %2128 = vmatpush3.bf16.msra.mxu0 %v2894_v13  ;;  %2149 = vmatprep.subr.bf16.mxu1 %v2772_v0 }
  0x80   :  { %2129 = vmatprep.subr.bf16.mxu0 %v2772_v0 }
  0x82   :  { %2150 = vmatpush3.bf16.msra.mxu1 %v2898_v15 }
  0x83   :  { %2130 = vmatpush3.bf16.msra.mxu0 %v2898_v15  ;;  %2151 = vmatprep.subr.bf16.mxu1 %v2772_v0 }
  0x84   :  { %2131 = vmatprep.subr.bf16.mxu0 %v2772_v0 }
  0x86   :  { %2152 = vmatpush3.bf16.msra.mxu1 %v2902_v17 }
  0x87   :  { %2132 = vmatpush3.bf16.msra.mxu0 %v2902_v17  ;;  %2177 = vmatprep.subr.bf16.mxu1 %v2772_v0 }
  0x88   :  { %2157 = vmatprep.subr.bf16.mxu0 %v2772_v0 }
 0x129   :  { %v407_v20 = vpop.f32.mrf.mxu1 }
 0x12a   :  { %v2944_v21 = vpop.f32.mrf.mxu0  ;;  %v422_v36 = vadd.f32 %v2959_v35, %v407_v20 }
 0x12b   :  { %v2115_v23 = vpop.f32.mrf.mxu1 }
 0x12c   :  { %v279_v24 = vpop.f32.mrf.mxu0 }
 0x12d   :  { %v280_v25 = vadd.f32 %v2949_v22, %v279_v24  ;;  %v410_v26 = vpop.f32.mrf.mxu1 }
 0x12e   :  { %v2997_v51 = vpop.f32.mrf.mxu0 }
 0x12f   :  { %v413_v27 = vadd.f32 %v407_v20, %v280_v25  ;;  %v2116_v28 = vpop.f32.mrf.mxu1 }
 0x130   :  { %v282_v52 = vpop.f32.mrf.mxu0  ;;  %v288_v28 = vadd.f32 %v2944_v21, %v2949_v22 }
 0x131   :  { %v1796_v29 = vmul.f32 -1.442695, %v413_v27  ;;  %v283_v57 = vadd.f32 %v2949_v22, %v282_v52 }
 0x132   :  { %v2999_v53 = vpop.f32.mrf.mxu0 }
 0x133   :  { %2518 = vpow2.f32 %v1796_v29 }
 0x134   :  { %v3001_v54 = vpop.f32.mrf.mxu0 }
 0x136   :  { %v3003_v55 = vpop.f32.mrf.mxu0 }
 0x138   :  { %v3005_v56 = vpop.f32.mrf.mxu0 }
 0x140   :  { %v2519_v30 = vpop.eup %2518 }
 0x141   :  { %v417_v31 = vadd.f32 1.0, %v2519_v30 }
 0x143   :  { %2520 = vrcp.f32 %v417_v31 }
 0x150   :  { %v2521_v32 = vpop.eup %2520 }
 0x151   :  { %420 = vrot.lane.b32.xlu0 %v2521_v32, %s2766_s22 }
 0x155   :  { %428 = vrot.lane.b32.xlu0 %v2521_v32, %s2775_s23 }
 0x1c3   :  { %v421_v37 = vpop.permute.xlu0 %420 }
 0x1c4   :  { %v423_v38 = vmul.f32 %v422_v36, %v421_v37 }
 0x1c6   :  { %v424_v39 = vadd.f32 %v423_v38, %v280_v25 }
 0x1c7   :  { %v429_v42 = vpop.permute.xlu0 %428 }
 0x1c8   :  { %2522 = vtanh.f32 %v424_v39  ;;  %v430_v44 = vsub.f32 1.0, %v429_v42  ;;  %v432_v46 = vmul.f32 0.0, %v429_v42 }
 0x1d5   :  { %v2523_v40 = vpop.eup %2522 }
 0x1d6   :  { %426 = vrot.lane.b32.xlu1 %v2523_v40, %s2766_s22 }
 0x248   :  { %v427_v45 = vpop.permute.xlu1 %426 }
 0x249   :  { %v431_v47 = vmul.f32 %v430_v44, %v427_v45 }
 0x24b   :  { %v2966_v48 = vadd.f32 %v432_v46, %v431_v47 }
 0x24d   :  { %v1798_v50 = vpack.c.bf16 %v2966_v48, %v2966_v48  ;;  %v434_v20 = vsel %vm124_vm1, %v2966_v48, 0.0 }
 0x24f   :  { %2134 = vmatmul.mubr.msk.bf16.vlgmr.msra.gmra.mxu0 %vm2971_vm2, %v1798_v50 }
 0x250   :  { %2158 = vmatpush3.bf16.msra.mxu0 %v2876_v2  ;;  %2173 = vmatprep.mubr.msk.bf16.mxu0 %vm2773_vm0, %v2772_v0 }
 0x251   :  { %2159 = vmatprep.subr.bf16.mxu0 %v2772_v0 }
 0x254   :  { %2160 = vmatpush3.bf16.msra.mxu0 %v2879_v4 }
 0x255   :  { %2161 = vmatprep.subr.bf16.mxu0 %v2772_v0 }
 0x258   :  { %2162 = vmatpush3.bf16.msra.mxu0 %v2883_v6 }
 0x259   :  { %2163 = vmatprep.subr.bf16.mxu0 %v2772_v0 }
 0x25c   :  { %2164 = vmatpush3.bf16.msra.mxu0 %v2887_v8 }
 0x25d   :  { %2165 = vmatprep.subr.bf16.mxu0 %v2772_v0 }
 0x260   :  { %2166 = vmatpush3.bf16.msra.mxu0 %v2890_v10 }
 0x261   :  { %2167 = vmatprep.subr.bf16.mxu0 %v2772_v0 }
 0x264   :  { %2168 = vmatpush3.bf16.msra.mxu0 %v2894_v13 }
 0x265   :  { %2169 = vmatprep.subr.bf16.mxu0 %v2772_v0 }
 0x268   :  { %2170 = vmatpush3.bf16.msra.mxu0 %v2898_v15 }
 0x269   :  { %2171 = vmatprep.subr.bf16.mxu0 %v2772_v0 }
 0x26c   :  { %2172 = vmatpush3.bf16.msra.mxu0 %v2902_v17 }
 0x26d   :  { %2197 = vmatprep.subr.bf16.mxu0 %v2772_v0 }
 0x30f   :  { %v473_v58 = vpop.f32.mrf.mxu0 }
 0x310   :  { %v479_v59 = vadd.f32 %v473_v58, %v283_v57  ;;  %v488_v7 = vadd.f32 %v2959_v35, %v473_v58 }
 0x311   :  { %v2135_v60 = vpop.f32.mrf.mxu0 }
 0x312   :  { %v1800_v61 = vmul.f32 -1.442695, %v479_v59  ;;  %v291_v59 = vadd.f32 %v2997_v51, %v2949_v22 }
 0x313   :  { %v476_v62 = vpop.f32.mrf.mxu0 }
 0x314   :  { %2524 = vpow2.f32 %v1800_v61 }
 0x315   :  { %v2136_v63 = vpop.f32.mrf.mxu0 }
 0x321   :  { %v2525_v1 = vpop.eup %2524 }
 0x322   :  { %v483_v3 = vadd.f32 1.0, %v2525_v1 }
 0x324   :  { %2526 = vrcp.f32 %v483_v3 }
 0x331   :  { %v2527_v5 = vpop.eup %2526 }
 0x332   :  { %494 = vrot.lane.b32.xlu0 %v2527_v5, %s2775_s23  ;;  %486 = vrot.lane.b32.xlu1 %v2527_v5, %s2766_s22 }
 0x3a4   :  { %v487_v9 = vpop.permute.xlu1 %486  ;;  %v495_v16 = vpop.permute.xlu0 %494 }
 0x3a5   :  { %v489_v11 = vmul.f32 %v488_v7, %v487_v9  ;;  %v496_v18 = vsub.f32 1.0, %v495_v16  ;;  %v498_v24 = vmul.f32 %v495_v16, %v434_v20 }
 0x3a7   :  { %v490_v12 = vadd.f32 %v489_v11, %v283_v57 }
 0x3a9   :  { %2528 = vtanh.f32 %v490_v12 }
 0x3b6   :  { %v2529_v14 = vpop.eup %2528 }
 0x3b7   :  { %492 = vrot.lane.b32.xlu1 %v2529_v14, %s2766_s22 }
 0x429   :  { %v493_v23 = vpop.permute.xlu1 %492 }
 0x42a   :  { %v497_v25 = vmul.f32 %v496_v18, %v493_v23 }
 0x42c   :  { %v3015_v26 = vadd.f32 %v498_v24, %v497_v25 }
 0x42e   :  { %v1802_v27 = vpack.c.bf16 %v3015_v26, %v3015_v26  ;;  %v500_v46 = vsel %vm124_vm1, %v3015_v26, 0.0 }
 0x430   :  { %2154 = vmatmul.mubr.msk.bf16.vlgmr.msra.gmra.mxu1 %vm2971_vm2, %v1802_v27 }
 0x431   :  { %2178 = vmatpush3.bf16.msra.mxu1 %v2876_v2  ;;  %2193 = vmatprep.mubr.msk.bf16.mxu1 %vm2773_vm0, %v2772_v0 }
 0x432   :  { %2179 = vmatprep.subr.bf16.mxu1 %v2772_v0 }
 0x435   :  { %2180 = vmatpush3.bf16.msra.mxu1 %v2879_v4 }
 0x436   :  { %2181 = vmatprep.subr.bf16.mxu1 %v2772_v0 }
 0x439   :  { %2182 = vmatpush3.bf16.msra.mxu1 %v2883_v6 }
 0x43a   :  { %2183 = vmatprep.subr.bf16.mxu1 %v2772_v0 }
 0x43d   :  { %2184 = vmatpush3.bf16.msra.mxu1 %v2887_v8 }
 0x43e   :  { %2185 = vmatprep.subr.bf16.mxu1 %v2772_v0 }
 0x441   :  { %2186 = vmatpush3.bf16.msra.mxu1 %v2890_v10 }
 0x442   :  { %2187 = vmatprep.subr.bf16.mxu1 %v2772_v0 }
 0x445   :  { %2188 = vmatpush3.bf16.msra.mxu1 %v2894_v13 }
 0x446   :  { %2189 = vmatprep.subr.bf16.mxu1 %v2772_v0 }
 0x449   :  { %2190 = vmatpush3.bf16.msra.mxu1 %v2898_v15 }
 0x44a   :  { %2191 = vmatprep.subr.bf16.mxu1 %v2772_v0 }
 0x44d   :  { %2192 = vmatpush3.bf16.msra.mxu1 %v2902_v17 }
 0x44e   :  { %2217 = vmatprep.subr.bf16.mxu1 %v2772_v0 }
 0x4f0   :  { %v540_v29 = vpop.f32.mrf.mxu1 }
 0x4f1   :  { %v546_v30 = vadd.f32 %v540_v29, %v288_v28  ;;  %v555_v39 = vadd.f32 %v2959_v35, %v540_v29 }
 0x4f2   :  { %v2155_v31 = vpop.f32.mrf.mxu1 }
 0x4f3   :  { %v1804_v32 = vmul.f32 -1.442695, %v546_v30  ;;  %v296_v30 = vadd.f32 %v2949_v22, %v3001_v54 }
 0x4f4   :  { %v543_v33 = vpop.f32.mrf.mxu1 }
 0x4f5   :  { %2530 = vpow2.f32 %v1804_v32 }
 0x4f6   :  { %v2156_v34 = vpop.f32.mrf.mxu1 }
 0x502   :  { %v2531_v36 = vpop.eup %2530 }
 0x503   :  { %v550_v37 = vadd.f32 1.0, %v2531_v36 }
 0x505   :  { %2532 = vrcp.f32 %v550_v37 }
 0x512   :  { %v2533_v38 = vpop.eup %2532 }
 0x513   :  { %561 = vrot.lane.b32.xlu1 %v2533_v38, %s2775_s23  ;;  %553 = vrot.lane.b32.xlu0 %v2533_v38, %s2766_s22 }
 0x585   :  { %v554_v40 = vpop.permute.xlu0 %553  ;;  %v562_v44 = vpop.permute.xlu1 %561 }
 0x586   :  { %v556_v41 = vmul.f32 %v555_v39, %v554_v40  ;;  %v563_v45 = vsub.f32 1.0, %v562_v44  ;;  %v565_v50 = vmul.f32 %v562_v44, %v500_v46 }
 0x588   :  { %v557_v21 = vadd.f32 %v556_v41, %v288_v28 }
 0x58a   :  { %2534 = vtanh.f32 %v557_v21 }
 0x597   :  { %v2535_v42 = vpop.eup %2534 }
 0x598   :  { %559 = vrot.lane.b32.xlu0 %v2535_v42, %s2766_s22 }
 0x60a   :  { %v560_v47 = vpop.permute.xlu0 %559 }
 0x60b   :  { %v564_v52 = vmul.f32 %v563_v45, %v560_v47 }
 0x60d   :  { %v3048_v57 = vadd.f32 %v565_v50, %v564_v52 }
 0x60f   :  { %v1806_v58 = vpack.c.bf16 %v3048_v57, %v3048_v57  ;;  %v567_v23 = vsel %vm124_vm1, %v3048_v57, 0.0 }
 0x611   :  { %2174 = vmatmul.mubr.msk.bf16.vlgmr.msra.gmra.mxu0 %vm2971_vm2, %v1806_v58 }
 0x612   :  { %2198 = vmatpush3.bf16.msra.mxu0 %v2876_v2  ;;  %2213 = vmatprep.mubr.msk.bf16.mxu0 %vm2773_vm0, %v2772_v0 }
 0x613   :  { %2199 = vmatprep.subr.bf16.mxu0 %v2772_v0 }
 0x616   :  { %2200 = vmatpush3.bf16.msra.mxu0 %v2879_v4 }
 0x617   :  { %2201 = vmatprep.subr.bf16.mxu0 %v2772_v0 }
 0x61a   :  { %2202 = vmatpush3.bf16.msra.mxu0 %v2883_v6 }
 0x61b   :  { %2203 = vmatprep.subr.bf16.mxu0 %v2772_v0 }
 0x61e   :  { %2204 = vmatpush3.bf16.msra.mxu0 %v2887_v8 }
 0x61f   :  { %2205 = vmatprep.subr.bf16.mxu0 %v2772_v0 }
 0x622   :  { %2206 = vmatpush3.bf16.msra.mxu0 %v2890_v10 }
 0x623   :  { %2207 = vmatprep.subr.bf16.mxu0 %v2772_v0 }
 0x626   :  { %2208 = vmatpush3.bf16.msra.mxu0 %v2894_v13 }
 0x627   :  { %2209 = vmatprep.subr.bf16.mxu0 %v2772_v0 }
 0x62a   :  { %2210 = vmatpush3.bf16.msra.mxu0 %v2898_v15 }
 0x62b   :  { %2211 = vmatprep.subr.bf16.mxu0 %v2772_v0 }
 0x62e   :  { %2212 = vmatpush3.bf16.msra.mxu0 %v2902_v17 }
 0x62f   :  { %2237 = vmatprep.subr.bf16.mxu0 %v2772_v0 }
 0x6d1   :  { %v607_v60 = vpop.f32.mrf.mxu0 }
 0x6d2   :  { %v613_v61 = vadd.f32 %v607_v60, %v291_v59  ;;  %v622_v11 = vadd.f32 %v2959_v35, %v607_v60 }
 0x6d3   :  { %v2175_v62 = vpop.f32.mrf.mxu0 }
 0x6d4   :  { %v1808_v63 = vmul.f32 -1.442695, %v613_v61 }
 0x6d5   :  { %v610_v1 = vpop.f32.mrf.mxu0 }
 0x6d6   :  { %2536 = vpow2.f32 %v1808_v63 }
 0x6d7   :  { %v2176_v3 = vpop.f32.mrf.mxu0 }
 0x6e3   :  { %v2537_v5 = vpop.eup %2536 }
 0x6e4   :  { %v617_v7 = vadd.f32 1.0, %v2537_v5  ;;  %v2494_v5 = vld [vmem:[#allocation10 + $0x38] sm:$0xff]  }
 0x6e6   :  { %2538 = vrcp.f32 %v617_v7 }
 0x6f3   :  { %v2539_v9 = vpop.eup %2538 }
 0x6f4   :  { %628 = vrot.lane.b32.xlu0 %v2539_v9, %s2775_s23  ;;  %620 = vrot.lane.b32.xlu1 %v2539_v9, %s2766_s22 }
 0x766   :  { %v621_v12 = vpop.permute.xlu1 %620  ;;  %v629_v18 = vpop.permute.xlu0 %628 }
 0x767   :  { %v623_v14 = vmul.f32 %v622_v11, %v621_v12  ;;  %v630_v20 = vsub.f32 1.0, %v629_v18  ;;  %v632_v25 = vmul.f32 %v629_v18, %v567_v23  ;;  %v2495_v23 = vld [vmem:[#allocation10 + $0x30] sm:$0xff]  }
 0x769   :  { %v624_v51 = vadd.f32 %v623_v14, %v291_v59 }
 0x76b   :  { %2540 = vtanh.f32 %v624_v51 }
 0x778   :  { %v2541_v16 = vpop.eup %2540 }
 0x779   :  { %626 = vrot.lane.b32.xlu1 %v2541_v16, %s2766_s22 }
 0x7eb   :  { %v627_v24 = vpop.permute.xlu1 %626 }
 0x7ec   :  { %v631_v27 = vmul.f32 %v630_v20, %v627_v24  ;;  %v1885_v24 = vpack.c.bf16 %v3015_v26, %v2966_v48  ;;  %v2500_v48 = vld [vmem:[#allocation10 + $0x8] sm:$0xff]   ;;  %v2501_v26 = vld [vmem:[#allocation10] sm:$0xff]  }
 0x7ee   :  { %v3081_v28 = vadd.f32 %v632_v25, %v631_v27  ;;  %v2496_v25 = vld [vmem:[#allocation10 + $0x28] sm:$0xff]   ;;  %v2497_v27 = vld [vmem:[#allocation10 + $0x20] sm:$0xff]  }
 0x7f0   :  { %v1810_v29 = vpack.c.bf16 %v3081_v28, %v3081_v28  ;;  %v634_v47 = vsel %vm124_vm1, %v3081_v28, 0.0 }
 0x7f2   :  { %2194 = vmatmul.mubr.msk.bf16.vlgmr.msra.gmra.mxu1 %vm2971_vm2, %v1810_v29  ;;  %v2498_v29 = vld [vmem:[#allocation10 + $0x18] sm:$0xff]  }
 0x7f3   :  { %2218 = vmatpush3.bf16.msra.mxu1 %v2876_v2  ;;  %2233 = vmatprep.mubr.msk.bf16.mxu1 %vm2773_vm0, %v2772_v0 }
 0x7f4   :  { %2219 = vmatprep.subr.bf16.mxu1 %v2772_v0 }
 0x7f7   :  { %2220 = vmatpush3.bf16.msra.mxu1 %v2879_v4 }
 0x7f8   :  { %2221 = vmatprep.subr.bf16.mxu1 %v2772_v0 }
 0x7fb   :  { %2222 = vmatpush3.bf16.msra.mxu1 %v2883_v6 }
 0x7fc   :  { %2223 = vmatprep.subr.bf16.mxu1 %v2772_v0 }
 0x7ff   :  { %2224 = vmatpush3.bf16.msra.mxu1 %v2887_v8 }
 0x800   :  { %2225 = vmatprep.subr.bf16.mxu1 %v2772_v0 }
 0x803   :  { %2226 = vmatpush3.bf16.msra.mxu1 %v2890_v10 }
 0x804   :  { %2227 = vmatprep.subr.bf16.mxu1 %v2772_v0 }
 0x807   :  { %2228 = vmatpush3.bf16.msra.mxu1 %v2894_v13 }
 0x808   :  { %2229 = vmatprep.subr.bf16.mxu1 %v2772_v0 }
 0x80b   :  { %2230 = vmatpush3.bf16.msra.mxu1 %v2898_v15 }
 0x80c   :  { %2231 = vmatprep.subr.bf16.mxu1 %v2772_v0 }
 0x80f   :  { %2232 = vmatpush3.bf16.msra.mxu1 %v2902_v17 }
 0x810   :  { %2257 = vmatprep.subr.bf16.mxu1 %v2494_v5 }
 0x8b2   :  { %v674_v31 = vpop.f32.mrf.mxu1 }
 0x8b3   :  { %v680_v32 = vadd.f32 %v674_v31, %v296_v30  ;;  %v689_v41 = vadd.f32 %v2959_v35, %v674_v31  ;;  %v1888_v31 = vpack.c.bf16 %v3081_v28, %v3048_v57 }
 0x8b4   :  { %v2195_v33 = vpop.f32.mrf.mxu1 }
 0x8b5   :  { %v1812_v34 = vmul.f32 -1.442695, %v680_v32  ;;  %v304_v33 = vadd.f32 %v2999_v53, %v2949_v22 }
 0x8b6   :  { %v677_v36 = vpop.f32.mrf.mxu1 }
 0x8b7   :  { %2542 = vpow2.f32 %v1812_v34 }
 0x8b8   :  { %v2196_v37 = vpop.f32.mrf.mxu1 }
 0x8c4   :  { %v2543_v38 = vpop.eup %2542 }
 0x8c5   :  { %v684_v39 = vadd.f32 1.0, %v2543_v38 }
 0x8c7   :  { %2544 = vrcp.f32 %v684_v39 }
 0x8d4   :  { %v2545_v40 = vpop.eup %2544 }
 0x8d5   :  { %695 = vrot.lane.b32.xlu1 %v2545_v40, %s2775_s23  ;;  %687 = vrot.lane.b32.xlu0 %v2545_v40, %s2766_s22 }
 0x947   :  { %v688_v21 = vpop.permute.xlu0 %687  ;;  %v696_v45 = vpop.permute.xlu1 %695 }
 0x948   :  { %v690_v42 = vmul.f32 %v689_v41, %v688_v21  ;;  %v697_v46 = vsub.f32 1.0, %v696_v45  ;;  %v699_v52 = vmul.f32 %v696_v45, %v634_v47  ;;  %v3174_v45 = vld [vmem:[#allocation12 + $0x30] sm:$0xff]   ;;  %v3179_v47 = vld [vmem:[#allocation12 + $0x28] sm:$0xff]  }
 0x94a   :  { %v691_v54 = vadd.f32 %v690_v42, %v296_v30  ;;  %v2499_v30 = vld [vmem:[#allocation10 + $0x10] sm:$0xff]  }
 0x94c   :  { %2546 = vtanh.f32 %v691_v54 }
 0x959   :  { %v2547_v44 = vpop.eup %2546 }
 0x95a   :  { %693 = vrot.lane.b32.xlu0 %v2547_v44, %s2766_s22  ;;  %v3170_v44 = vld [vmem:[#allocation12 + $0x38] sm:$0xff]  }
 0x9cc   :  { %v694_v50 = vpop.permute.xlu0 %693 }
 0x9cd   :  { %v698_v58 = vmul.f32 %v697_v46, %v694_v50  ;;  %v3183_v50 = vld [vmem:[#allocation12 + $0x20] sm:$0xff]  }
 0x9cf   :  { %v3113_v59 = vadd.f32 %v699_v52, %v698_v58  ;;  %v3187_v52 = vld [vmem:[#allocation12 + $0x18] sm:$0xff]   ;;  %v3191_v58 = vld [vmem:[#allocation12 + $0x10] sm:$0xff]  }
 0x9d1   :  { %v1814_v60 = vpack.c.bf16 %v3113_v59, %v3113_v59  ;;  %v701_v12 = vsel %vm124_vm1, %v3113_v59, 0.0 }
 0x9d3   :  { %2214 = vmatmul.mubr.msk.bf16.vlgmr.msra.gmra.mxu0 %vm2971_vm2, %v1814_v60  ;;  %v3199_v60 = vld [vmem:[#allocation12] sm:$0xff]  }
 0x9d4   :  { %2238 = vmatpush3.bf16.msra.mxu0 %v2876_v2  ;;  %2253 = vmatprep.mubr.msk.bf16.mxu0 %vm2773_vm0, %v2772_v0  ;;  %v299_v2 = vadd.f32 %v2949_v22, %v3005_v56 }
 0x9d5   :  { %2239 = vmatprep.subr.bf16.mxu0 %v2772_v0 }
 0x9d8   :  { %2240 = vmatpush3.bf16.msra.mxu0 %v2879_v4 }
 0x9d9   :  { %2241 = vmatprep.subr.bf16.mxu0 %v2772_v0 }
 0x9dc   :  { %2242 = vmatpush3.bf16.msra.mxu0 %v2883_v6 }
 0x9dd   :  { %2243 = vmatprep.subr.bf16.mxu0 %v2772_v0 }
 0x9e0   :  { %2244 = vmatpush3.bf16.msra.mxu0 %v2887_v8 }
 0x9e1   :  { %2245 = vmatprep.subr.bf16.mxu0 %v2772_v0 }
 0x9e4   :  { %2246 = vmatpush3.bf16.msra.mxu0 %v2890_v10 }
 0x9e5   :  { %2247 = vmatprep.subr.bf16.mxu0 %v2772_v0 }
 0x9e8   :  { %2248 = vmatpush3.bf16.msra.mxu0 %v2894_v13 }
 0x9e9   :  { %2249 = vmatprep.subr.bf16.mxu0 %v2772_v0 }
 0x9ec   :  { %2250 = vmatpush3.bf16.msra.mxu0 %v2898_v15 }
 0x9ed   :  { %2251 = vmatprep.subr.bf16.mxu0 %v2772_v0 }
 0x9f0   :  { %2252 = vmatpush3.bf16.msra.mxu0 %v2902_v17 }
 0x9f1   :  { %2281 = vmatprep.subr.bf16.mxu0 %v2772_v0 }
 0xa93   :  { %v741_v4 = vpop.f32.mrf.mxu0 }
 0xa94   :  { %v747_v6 = vadd.f32 %v741_v4, %v299_v2  ;;  %v756_v17 = vadd.f32 %v2959_v35, %v741_v4 }
 0xa95   :  { %v2215_v8 = vpop.f32.mrf.mxu0 }
 0xa96   :  { %v1816_v10 = vmul.f32 -1.442695, %v747_v6 }
 0xa97   :  { %v744_v61 = vpop.f32.mrf.mxu0 }
 0xa98   :  { %2548 = vpow2.f32 %v1816_v10 }
 0xa99   :  { %v2216_v13 = vpop.f32.mrf.mxu0 }
 0xaa5   :  { %v2549_v62 = vpop.eup %2548 }
 0xaa6   :  { %v751_v63 = vadd.f32 1.0, %v2549_v62 }
 0xaa8   :  { %2550 = vrcp.f32 %v751_v63 }
 0xab5   :  { %v2551_v15 = vpop.eup %2550 }
 0xab6   :  { %762 = vrot.lane.b32.xlu0 %v2551_v15, %s2775_s23  ;;  %754 = vrot.lane.b32.xlu1 %v2551_v15, %s2766_s22 }
 0xb28   :  { %v755_v1 = vpop.permute.xlu1 %754  ;;  %v763_v9 = vpop.permute.xlu0 %762 }
 0xb29   :  { %v757_v3 = vmul.f32 %v756_v17, %v755_v1  ;;  %v764_v11 = vsub.f32 1.0, %v763_v9  ;;  %v766_v51 = vmul.f32 %v763_v9, %v701_v12  ;;  %v3256_v12 = vld [vmem:[%s3472_s7] ss:$0 sm:$0xff] }
 0xb2b   :  { %v758_v56 = vadd.f32 %v757_v3, %v299_v2 }
 0xb2d   :  { %2552 = vtanh.f32 %v758_v56 }
 0xb3a   :  { %v2553_v7 = vpop.eup %2552 }
 0xb3b   :  { %760 = vrot.lane.b32.xlu1 %v2553_v7, %s2766_s22 }
 0xbad   :  { %v761_v14 = vpop.permute.xlu1 %760 }
 0xbae   :  { %v765_v16 = vmul.f32 %v764_v11, %v761_v14 }
 0xbb0   :  { %v3146_v18 = vadd.f32 %v766_v51, %v765_v16 }
 0xbb2   :  { %v1818_v20 = vpack.c.bf16 %v3146_v18, %v3146_v18  ;;  %v1891_v32 = vpack.c.bf16 %v3146_v18, %v3113_v59  ;;  %v3195_v59 = vld [vmem:[#allocation12 + $0x8] sm:$0xff]   ;;  %v768_v6 = vsel %vm124_vm1, %v3146_v18, 0.0 }
 0xbb4   :  { %2234 = vmatmul.mubr.msk.bf16.vlgmr.msra.gmra.mxu1 %vm2971_vm2, %v1818_v20 }
 0xbb5   :  { %2258 = vmatpush3.bf16.msra.mxu1 %v2494_v5  ;;  %2273 = vmatprep.mubr.msk.bf16.mxu1 %vm2971_vm2, %v1885_v24 }
 0xbb6   :  { %2259 = vmatprep.subr.bf16.mxu1 %v2495_v23 }
 0xbb9   :  { %2260 = vmatpush3.bf16.msra.mxu1 %v2495_v23 }
 0xbba   :  { %2261 = vmatprep.subr.bf16.mxu1 %v2496_v25 }
 0xbbd   :  { %2262 = vmatpush3.bf16.msra.mxu1 %v2496_v25 }
 0xbbe   :  { %2263 = vmatprep.subr.bf16.mxu1 %v2497_v27 }
 0xbc1   :  { %2264 = vmatpush3.bf16.msra.mxu1 %v2497_v27 }
 0xbc2   :  { %2265 = vmatprep.subr.bf16.mxu1 %v2498_v29 }
 0xbc5   :  { %2266 = vmatpush3.bf16.msra.mxu1 %v2498_v29 }
 0xbc6   :  { %2267 = vmatprep.subr.bf16.mxu1 %v2499_v30 }
 0xbc9   :  { %2268 = vmatpush3.bf16.msra.mxu1 %v2499_v30 }
 0xbca   :  { %2269 = vmatprep.subr.bf16.mxu1 %v2500_v48 }
 0xbcd   :  { %2270 = vmatpush3.bf16.msra.mxu1 %v2500_v48 }
 0xbce   :  { %2271 = vmatprep.subr.bf16.mxu1 %v2501_v26 }
 0xbd1   :  { %2272 = vmatpush3.bf16.msra.mxu1 %v2501_v26 }
 0xbd2   :  { %2301 = vmatprep.subr.bf16.mxu1 %v2772_v0 }
 0xbd4   :  { %2274 = vmatmul.mubr.msk.bf16.vlgmr.msra.gmra.mxu1 %vm2971_vm2, %v1888_v31 }
 0xbd5   :  { %2277 = vmatprep.mubr.msk.bf16.mxu1 %vm2971_vm2, %v1891_v32  ;;  %2302 = vmatpush3.bf16.msra.mxu1 %v3170_v44  ;;  %v3268_v32 = vld [vmem:[%s3473_s8] ss:$0 sm:$0xff] }
 0xbd6   :  { %2303 = vmatprep.subr.bf16.mxu1 %v2772_v0 }
 0xbd9   :  { %2304 = vmatpush3.bf16.msra.mxu1 %v3174_v45 }
 0xbda   :  { %2305 = vmatprep.subr.bf16.mxu1 %v2772_v0 }
 0xbdd   :  { %2306 = vmatpush3.bf16.msra.mxu1 %v3179_v47 }
 0xbde   :  { %2307 = vmatprep.subr.bf16.mxu1 %v2772_v0 }
 0xbe1   :  { %2308 = vmatpush3.bf16.msra.mxu1 %v3183_v50 }
 0xbe2   :  { %2309 = vmatprep.subr.bf16.mxu1 %v2772_v0 }
 0xbe5   :  { %2310 = vmatpush3.bf16.msra.mxu1 %v3187_v52 }
 0xbe6   :  { %2311 = vmatprep.subr.bf16.mxu1 %v2772_v0 }
 0xbe9   :  { %2312 = vmatpush3.bf16.msra.mxu1 %v3191_v58 }
 0xbea   :  { %2313 = vmatprep.subr.bf16.mxu1 %v2772_v0 }
 0xbed   :  { %2314 = vmatpush3.bf16.msra.mxu1 %v3195_v59 }
 0xbee   :  { %2315 = vmatprep.subr.bf16.mxu1 %v2772_v0 }
 0xbf1   :  { %2316 = vmatpush3.bf16.msra.mxu1 %v3199_v60 }
 0xbf2   :  { %2341 = vmatprep.subr.bf16.mxu1 %v2772_v0 }
 0xc74   :  { %v808_v34 = vpop.f32.mrf.mxu1 }
 0xc75   :  { %v814_v36 = vadd.f32 %v808_v34, %v304_v33  ;;  %v823_v21 = vadd.f32 %v2959_v35, %v808_v34 }
 0xc76   :  { %v2235_v37 = vpop.f32.mrf.mxu1 }
 0xc77   :  { %v1820_v38 = vmul.f32 -1.442695, %v814_v36 }
 0xc78   :  { %v811_v39 = vpop.f32.mrf.mxu1 }
 0xc79   :  { %2554 = vpow2.f32 %v1820_v38 }
 0xc7a   :  { %v2236_v57 = vpop.f32.mrf.mxu1 }
 0xc86   :  { %v2555_v28 = vpop.eup %2554 }
 0xc87   :  { %v818_v40 = vadd.f32 1.0, %v2555_v28 }
 0xc89   :  { %2556 = vrcp.f32 %v818_v40 }
 0xc94   :  { %v3251_v9 = vpop.f32.mrf.mxu1 }
 0xc96   :  { %v2557_v41 = vpop.eup %2556  ;;  %v1039_v11 = vpop.f32.mrf.mxu1 }
 0xc97   :  { %829 = vrot.lane.b32.xlu1 %v2557_v41, %s2775_s23  ;;  %821 = vrot.lane.b32.xlu0 %v2557_v41, %s2766_s22 }
 0xd09   :  { %v822_v42 = vpop.permute.xlu0 %821  ;;  %v830_v2 = vpop.permute.xlu1 %829 }
 0xd0a   :  { %v824_v54 = vmul.f32 %v823_v21, %v822_v42  ;;  %v831_v4 = vsub.f32 1.0, %v830_v2  ;;  %v833_v10 = vmul.f32 %v830_v2, %v768_v6 }
 0xd0c   :  { %v825_v53 = vadd.f32 %v824_v54, %v304_v33 }
 0xd0e   :  { %2558 = vtanh.f32 %v825_v53 }
 0xd1b   :  { %v2559_v46 = vpop.eup %2558 }
 0xd1c   :  { %827 = vrot.lane.b32.xlu0 %v2559_v46, %s2766_s22 }
 0xd8e   :  { %v828_v8 = vpop.permute.xlu0 %827 }
 0xd8f   :  { %v832_v61 = vmul.f32 %v831_v4, %v828_v8 }
 0xd91   :  { %v3206_v13 = vadd.f32 %v833_v10, %v832_v61  ;;  %v3300_v10 = vpop.f32.mrf.mxu1 }
 0xd93   :  { %v1822_v62 = vpack.c.bf16 %v3206_v13, %v3206_v13  ;;  %v835_v57 = vsel %vm124_vm1, %v3206_v13, 0.0  ;;  %v1042_v61 = vpop.f32.mrf.mxu1 }
 0xd95   :  { %2254 = vmatmul.mubr.msk.bf16.vlgmr.msra.gmra.mxu0 %vm2971_vm2, %v1822_v62 }
 0xd96   :  { %2282 = vmatpush3.bf16.msra.mxu0 %v3170_v44  ;;  %2297 = vmatprep.mubr.msk.bf16.mxu0 %vm2773_vm0, %v2772_v0 }
 0xd97   :  { %2283 = vmatprep.subr.bf16.mxu0 %v2772_v0 }
 0xd9a   :  { %2284 = vmatpush3.bf16.msra.mxu0 %v3174_v45 }
 0xd9b   :  { %2285 = vmatprep.subr.bf16.mxu0 %v2772_v0 }
 0xd9e   :  { %2286 = vmatpush3.bf16.msra.mxu0 %v3179_v47 }
 0xd9f   :  { %2287 = vmatprep.subr.bf16.mxu0 %v2772_v0 }
 0xda2   :  { %2288 = vmatpush3.bf16.msra.mxu0 %v3183_v50 }
 0xda3   :  { %2289 = vmatprep.subr.bf16.mxu0 %v2772_v0 }
 0xda6   :  { %2290 = vmatpush3.bf16.msra.mxu0 %v3187_v52 }
 0xda7   :  { %2291 = vmatprep.subr.bf16.mxu0 %v2772_v0 }
 0xdaa   :  { %2292 = vmatpush3.bf16.msra.mxu0 %v3191_v58 }
 0xdab   :  { %2293 = vmatprep.subr.bf16.mxu0 %v2772_v0 }
 0xdae   :  { %2294 = vmatpush3.bf16.msra.mxu0 %v3195_v59 }
 0xdaf   :  { %2295 = vmatprep.subr.bf16.mxu0 %v2772_v0 }
 0xdb2   :  { %2296 = vmatpush3.bf16.msra.mxu0 %v3199_v60 }
 0xdb3   :  { %2321 = vmatprep.subr.bf16.mxu0 %v2772_v0 }
 0xdb5   :  { %2298 = vmatmul.mubr.bf16.vlgmr.msra.gmra.mxu0 %v2774_v19  ;;  %v307_v19 = vadd.f32 %v3003_v55, %v2949_v22  ;;  %v1040_v22 = vadd.f32 %v3256_v12, %v1039_v11 }
 0xdb6   :  { %2322 = vmatpush3.bf16.msra.mxu0 %v3170_v44  ;;  %2337 = vmatprep.mubr.msk.bf16.mxu0 %vm2773_vm0, %v2772_v0 }
 0xdb7   :  { %2323 = vmatprep.subr.bf16.mxu0 %v2772_v0 }
 0xdba   :  { %2324 = vmatpush3.bf16.msra.mxu0 %v3174_v45 }
 0xdbb   :  { %2325 = vmatprep.subr.bf16.mxu0 %v2772_v0 }
 0xdbe   :  { %2326 = vmatpush3.bf16.msra.mxu0 %v3179_v47 }
 0xdbf   :  { %2327 = vmatprep.subr.bf16.mxu0 %v2772_v0 }
 0xdc2   :  { %2328 = vmatpush3.bf16.msra.mxu0 %v3183_v50 }
 0xdc3   :  { %2329 = vmatprep.subr.bf16.mxu0 %v2772_v0 }
 0xdc6   :  { %2330 = vmatpush3.bf16.msra.mxu0 %v3187_v52 }
 0xdc7   :  { %2331 = vmatprep.subr.bf16.mxu0 %v2772_v0 }
 0xdca   :  { %2332 = vmatpush3.bf16.msra.mxu0 %v3191_v58 }
 0xdcb   :  { %2333 = vmatprep.subr.bf16.mxu0 %v2772_v0 }
 0xdce   :  { %2334 = vmatpush3.bf16.msra.mxu0 %v3195_v59 }
 0xdcf   :  { %2335 = vmatprep.subr.bf16.mxu0 %v2772_v0 }
 0xdd2   :  { %2336 = vmatpush3.bf16.msra.mxu0 %v3199_v60 }
 0xdd3   :  { %2361 = vmatprep.subr.bf16.mxu0 %v2772_v0 }
 0xe55   :  { %v875_v63 = vpop.f32.mrf.mxu0 }
 0xe56   :  { %v881_v15 = vadd.f32 %v875_v63, %v307_v19  ;;  %v890_v29 = vadd.f32 %v2959_v35, %v875_v63 }
 0xe57   :  { %v2255_v17 = vpop.f32.mrf.mxu0 }
 0xe58   :  { %v1824_v1 = vmul.f32 -1.442695, %v881_v15  ;;  %v1043_v15 = vadd.f32 %v3256_v12, %v1042_v61 }
 0xe59   :  { %v878_v3 = vpop.f32.mrf.mxu0 }
 0xe5a   :  { %2560 = vpow2.f32 %v1824_v1 }
 0xe5b   :  { %v2256_v56 = vpop.f32.mrf.mxu0 }
 0xe67   :  { %v2561_v5 = vpop.eup %2560 }
 0xe68   :  { %v885_v7 = vadd.f32 1.0, %v2561_v5 }
 0xe6a   :  { %2562 = vrcp.f32 %v885_v7 }
 0xe75   :  { %v1167_v55 = vpop.f32.mrf.mxu0 }
 0xe76   :  { %v1173_v14 = vadd.f32 %v1167_v55, %v1040_v22  ;;  %v1182_v33 = vadd.f32 %v3268_v32, %v1167_v55 }
 0xe77   :  { %v2563_v51 = vpop.eup %2562  ;;  %v2299_v16 = vpop.f32.mrf.mxu0 }
 0xe78   :  { %v1843_v18 = vmul.f32 -1.442695, %v1173_v14  ;;  %888 = vrot.lane.b32.xlu1 %v2563_v51, %s2766_s22 }
 0xe79   :  { %v1170_v20 = vpop.f32.mrf.mxu0 }
 0xe7a   :  { %2564 = vpow2.f32 %v1843_v18 }
 0xe7b   :  { %v2300_v23 = vpop.f32.mrf.mxu0 }
 0xe7c   :  { %896 = vrot.lane.b32.xlu1 %v2563_v51, %s2775_s23 }
 0xe87   :  { %v2565_v24 = vpop.eup %2564 }
 0xe88   :  { %v1177_v25 = vadd.f32 1.0, %v2565_v24 }
 0xe8a   :  { %2566 = vrcp.f32 %v1177_v25 }
 0xe97   :  { %v2567_v27 = vpop.eup %2566 }
 0xe98   :  { %1188 = vrot.lane.b32.xlu1 %v2567_v27, %s2775_s23  ;;  %1180 = vrot.lane.b32.xlu0 %v2567_v27, %s2766_s22 }
 0xeea   :  { %v889_v30 = vpop.permute.xlu1 %888 }
 0xeeb   :  { %v891_v48 = vmul.f32 %v890_v29, %v889_v30 }
 0xeed   :  { %v892_v26 = vadd.f32 %v891_v48, %v307_v19 }
 0xeee   :  { %v897_v35 = vpop.permute.xlu1 %896 }
 0xeef   :  { %2568 = vtanh.f32 %v892_v26  ;;  %v898_v39 = vsub.f32 1.0, %v897_v35  ;;  %v900_v40 = vmul.f32 %v897_v35, %v835_v57 }
 0xefc   :  { %v2569_v31 = vpop.eup %2568 }
 0xefd   :  { %894 = vrot.lane.b32.xlu0 %v2569_v31, %s2766_s22  ;;  %v1048_v31 = vadd.f32 %v3251_v9, %v3256_v12 }
 0xf0a   :  { %v1181_v34 = vpop.permute.xlu0 %1180  ;;  %v1189_v54 = vpop.permute.xlu1 %1188 }
 0xf0b   :  { %v1183_v36 = vmul.f32 %v1182_v33, %v1181_v34  ;;  %v1190_v53 = vsub.f32 1.0, %v1189_v54  ;;  %v1192_v2 = vmul.f32 0.0, %v1189_v54 }
 0xf0d   :  { %v1184_v37 = vadd.f32 %v1183_v36, %v1040_v22 }
 0xf0f   :  { %2570 = vtanh.f32 %v1184_v37 }
 0xf1c   :  { %v2571_v38 = vpop.eup %2570 }
 0xf1d   :  { %1186 = vrot.lane.b32.xlu0 %v2571_v38, %s2766_s22 }
 0xf6f   :  { %v895_v28 = vpop.permute.xlu0 %894 }
 0xf70   :  { %v899_v41 = vmul.f32 %v898_v39, %v895_v28 }
 0xf72   :  { %v901_v21 = vadd.f32 %v900_v40, %v899_v41 }
 0xf74   :  { %v1894_v42 = vpack.c.bf16 %v901_v21, %v3206_v13 }
 0xf76   :  { %2278 = vmatmul.mubr.msk.bf16.gmra.mxu1 %vm2971_vm2, %v1894_v42 }
 0xf77   :  { %2317 = vmatprep.mubr.msk.bf16.mxu1 %vm2773_vm0, %v2772_v0 }
 0xf8f   :  { %v1187_v46 = vpop.permute.xlu0 %1186 }
 0xf90   :  { %v1191_v4 = vmul.f32 %v1190_v53, %v1187_v46 }
 0xf92   :  { %v1193_v6 = vadd.f32 %v1192_v2, %v1191_v4 }
 0xf94   :  { %v1845_v8 = vpack.c.bf16 %v1193_v6, %v1193_v6  ;;  %v1194_v25 = vsel %vm124_vm1, %v1193_v6, 0.0 }
 0xf96   :  { %2318 = vmatmul.mubr.msk.bf16.vlgmr.msra.gmra.mxu1 %vm2971_vm2, %v1845_v8 }
 0xf97   :  { %2342 = vmatpush3.bf16.msra.mxu1 %v3170_v44  ;;  %2357 = vmatprep.mubr.msk.bf16.mxu1 %vm2773_vm0, %v2772_v0 }
 0xf98   :  { %2343 = vmatprep.subr.bf16.mxu1 %v2772_v0 }
 0xf9b   :  { %2344 = vmatpush3.bf16.msra.mxu1 %v3174_v45 }
 0xf9c   :  { %2345 = vmatprep.subr.bf16.mxu1 %v2772_v0 }
 0xf9f   :  { %2346 = vmatpush3.bf16.msra.mxu1 %v3179_v47 }
 0xfa0   :  { %2347 = vmatprep.subr.bf16.mxu1 %v2772_v0 }
 0xfa3   :  { %2348 = vmatpush3.bf16.msra.mxu1 %v3183_v50 }
 0xfa4   :  { %2349 = vmatprep.subr.bf16.mxu1 %v2772_v0 }
 0xfa7   :  { %2350 = vmatpush3.bf16.msra.mxu1 %v3187_v52 }
 0xfa8   :  { %2351 = vmatprep.subr.bf16.mxu1 %v2772_v0 }
 0xfab   :  { %2352 = vmatpush3.bf16.msra.mxu1 %v3191_v58 }
 0xfac   :  { %2353 = vmatprep.subr.bf16.mxu1 %v2772_v0 }
 0xfaf   :  { %2354 = vmatpush3.bf16.msra.mxu1 %v3195_v59 }
 0xfb0   :  { %2355 = vmatprep.subr.bf16.mxu1 %v2772_v0 }
 0xfb3   :  { %2356 = vmatpush3.bf16.msra.mxu1 %v3199_v60 }
 0xfb4   :  { %2381 = vmatprep.subr.bf16.mxu1 %v2772_v0 }
0x1036   :  { %v3302_v13 = vpop.f32.mrf.mxu1 }
0x1038   :  { %v3304_v62 = vpop.f32.mrf.mxu1 }
0x103a   :  { %v3306_v19 = vpop.f32.mrf.mxu1 }
0x103c   :  { %v3308_v63 = vpop.f32.mrf.mxu1 }
0x1056   :  { %v1231_v17 = vpop.f32.mrf.mxu1 }
0x1057   :  { %v1237_v1 = vadd.f32 %v1231_v17, %v1043_v15  ;;  %v1246_v14 = vadd.f32 %v3268_v32, %v1231_v17 }
0x1058   :  { %v2319_v3 = vpop.f32.mrf.mxu1 }
0x1059   :  { %v1847_v56 = vmul.f32 -1.442695, %v1237_v1 }
0x105a   :  { %v1234_v5 = vpop.f32.mrf.mxu1 }
0x105b   :  { %2572 = vpow2.f32 %v1847_v56 }
0x105c   :  { %v2320_v7 = vpop.f32.mrf.mxu1 }
0x1068   :  { %v2573_v11 = vpop.eup %2572 }
0x1069   :  { %v1241_v22 = vadd.f32 1.0, %v2573_v11 }
0x106b   :  { %2574 = vrcp.f32 %v1241_v22 }
0x1078   :  { %v2575_v55 = vpop.eup %2574 }
0x1079   :  { %1252 = vrot.lane.b32.xlu0 %v2575_v55, %s2775_s23  ;;  %1244 = vrot.lane.b32.xlu1 %v2575_v55, %s2766_s22 }
0x10eb   :  { %v1245_v51 = vpop.permute.xlu1 %1244  ;;  %v1253_v23 = vpop.permute.xlu0 %1252 }
0x10ec   :  { %v1247_v16 = vmul.f32 %v1246_v14, %v1245_v51  ;;  %v1254_v24 = vsub.f32 1.0, %v1253_v23  ;;  %v1256_v29 = vmul.f32 %v1253_v23, %v1194_v25 }
0x10ee   :  { %v1248_v18 = vadd.f32 %v1247_v16, %v1043_v15  ;;  %v1051_v15 = vadd.f32 %v3300_v10, %v3256_v12 }
0x10f0   :  { %2576 = vtanh.f32 %v1248_v18 }
0x10fd   :  { %v2577_v20 = vpop.eup %2576 }
0x10fe   :  { %1250 = vrot.lane.b32.xlu1 %v2577_v20, %s2766_s22 }
0x1170   :  { %v1251_v27 = vpop.permute.xlu1 %1250 }
0x1171   :  { %v1255_v30 = vmul.f32 %v1254_v24, %v1251_v27 }
0x1173   :  { %v1257_v48 = vadd.f32 %v1256_v29, %v1255_v30 }
0x1175   :  { %v1849_v26 = vpack.c.bf16 %v1257_v48, %v1257_v48  ;;  %v1258_v46 = vsel %vm124_vm1, %v1257_v48, 0.0 }
0x1177   :  { %2338 = vmatmul.mubr.msk.bf16.vlgmr.msra.gmra.mxu0 %vm2971_vm2, %v1849_v26  ;;  %v1056_v26 = vadd.f32 %v3256_v12, %v3304_v62 }
0x1178   :  { %2362 = vmatpush3.bf16.msra.mxu0 %v3170_v44  ;;  %2377 = vmatprep.mubr.msk.bf16.mxu0 %vm2773_vm0, %v2772_v0 }
0x1179   :  { %2363 = vmatprep.subr.bf16.mxu0 %v2772_v0 }
0x117c   :  { %2364 = vmatpush3.bf16.msra.mxu0 %v3174_v45 }
0x117d   :  { %2365 = vmatprep.subr.bf16.mxu0 %v2772_v0 }
0x1180   :  { %2366 = vmatpush3.bf16.msra.mxu0 %v3179_v47 }
0x1181   :  { %2367 = vmatprep.subr.bf16.mxu0 %v2772_v0 }
0x1184   :  { %2368 = vmatpush3.bf16.msra.mxu0 %v3183_v50 }
0x1185   :  { %2369 = vmatprep.subr.bf16.mxu0 %v2772_v0 }
0x1188   :  { %2370 = vmatpush3.bf16.msra.mxu0 %v3187_v52 }
0x1189   :  { %2371 = vmatprep.subr.bf16.mxu0 %v2772_v0 }
0x118c   :  { %2372 = vmatpush3.bf16.msra.mxu0 %v3191_v58 }
0x118d   :  { %2373 = vmatprep.subr.bf16.mxu0 %v2772_v0 }
0x1190   :  { %2374 = vmatpush3.bf16.msra.mxu0 %v3195_v59 }
0x1191   :  { %2375 = vmatprep.subr.bf16.mxu0 %v2772_v0 }
0x1194   :  { %2376 = vmatpush3.bf16.msra.mxu0 %v3199_v60 }
0x1195   :  { %2401 = vmatprep.subr.bf16.mxu0 %v2772_v0 }
0x1237   :  { %v1295_v33 = vpop.f32.mrf.mxu0 }
0x1238   :  { %v1301_v34 = vadd.f32 %v1295_v33, %v1048_v31  ;;  %v1310_v40 = vadd.f32 %v3268_v32, %v1295_v33 }
0x1239   :  { %v2339_v36 = vpop.f32.mrf.mxu0 }
0x123a   :  { %v1851_v37 = vmul.f32 -1.442695, %v1301_v34 }
0x123b   :  { %v1298_v38 = vpop.f32.mrf.mxu0 }
0x123c   :  { %2578 = vpow2.f32 %v1851_v37 }
0x123d   :  { %v2340_v35 = vpop.f32.mrf.mxu0 }
0x1249   :  { %v2579_v39 = vpop.eup %2578 }
0x124a   :  { %v1305_v57 = vadd.f32 1.0, %v2579_v39 }
0x124c   :  { %2580 = vrcp.f32 %v1305_v57 }
0x1259   :  { %v2581_v28 = vpop.eup %2580 }
0x125a   :  { %1316 = vrot.lane.b32.xlu1 %v2581_v28, %s2775_s23  ;;  %1308 = vrot.lane.b32.xlu0 %v2581_v28, %s2766_s22 }
0x12cc   :  { %v1309_v41 = vpop.permute.xlu0 %1308  ;;  %v1317_v54 = vpop.permute.xlu1 %1316 }
0x12cd   :  { %v1311_v21 = vmul.f32 %v1310_v40, %v1309_v41  ;;  %v1318_v53 = vsub.f32 1.0, %v1317_v54  ;;  %v1320_v4 = vmul.f32 %v1317_v54, %v1258_v46 }
0x12cf   :  { %v1312_v9 = vadd.f32 %v1311_v21, %v1048_v31 }
0x12d1   :  { %2582 = vtanh.f32 %v1312_v9 }
0x12de   :  { %v2583_v42 = vpop.eup %2582 }
0x12df   :  { %1314 = vrot.lane.b32.xlu0 %v2583_v42, %s2766_s22 }
0x1351   :  { %v1315_v2 = vpop.permute.xlu0 %1314 }
0x1352   :  { %v1319_v6 = vmul.f32 %v1318_v53, %v1315_v2 }
0x1354   :  { %v1321_v8 = vadd.f32 %v1320_v4, %v1319_v6 }
0x1356   :  { %v1853_v61 = vpack.c.bf16 %v1321_v8, %v1321_v8  ;;  %v1322_v24 = vsel %vm124_vm1, %v1321_v8, 0.0 }
0x1358   :  { %2358 = vmatmul.mubr.msk.bf16.vlgmr.msra.gmra.mxu1 %vm2971_vm2, %v1853_v61 }
0x1359   :  { %2382 = vmatpush3.bf16.msra.mxu1 %v3170_v44  ;;  %2397 = vmatprep.mubr.msk.bf16.mxu1 %vm2773_vm0, %v2772_v0 }
0x135a   :  { %2383 = vmatprep.subr.bf16.mxu1 %v2772_v0 }
0x135d   :  { %2384 = vmatpush3.bf16.msra.mxu1 %v3174_v45 }
0x135e   :  { %2385 = vmatprep.subr.bf16.mxu1 %v2772_v0 }
0x1361   :  { %2386 = vmatpush3.bf16.msra.mxu1 %v3179_v47 }
0x1362   :  { %2387 = vmatprep.subr.bf16.mxu1 %v2772_v0 }
0x1365   :  { %2388 = vmatpush3.bf16.msra.mxu1 %v3183_v50 }
0x1366   :  { %2389 = vmatprep.subr.bf16.mxu1 %v2772_v0 }
0x1369   :  { %2390 = vmatpush3.bf16.msra.mxu1 %v3187_v52 }
0x136a   :  { %2391 = vmatprep.subr.bf16.mxu1 %v2772_v0 }
0x136d   :  { %2392 = vmatpush3.bf16.msra.mxu1 %v3191_v58 }
0x136e   :  { %2393 = vmatprep.subr.bf16.mxu1 %v2772_v0 }
0x1371   :  { %2394 = vmatpush3.bf16.msra.mxu1 %v3195_v59 }
0x1372   :  { %2395 = vmatprep.subr.bf16.mxu1 %v2772_v0 }
0x1375   :  { %2396 = vmatpush3.bf16.msra.mxu1 %v3199_v60 }
0x1376   :  { %2421 = vmatprep.subr.bf16.mxu1 %v2772_v0 }
0x1418   :  { %v1359_v17 = vpop.f32.mrf.mxu1 }
0x1419   :  { %v1365_v1 = vadd.f32 %v1359_v17, %v1051_v15  ;;  %v1374_v14 = vadd.f32 %v3268_v32, %v1359_v17 }
0x141a   :  { %v2359_v3 = vpop.f32.mrf.mxu1 }
0x141b   :  { %v1855_v56 = vmul.f32 -1.442695, %v1365_v1 }
0x141c   :  { %v1362_v5 = vpop.f32.mrf.mxu1 }
0x141d   :  { %2584 = vpow2.f32 %v1855_v56 }
0x141e   :  { %v2360_v7 = vpop.f32.mrf.mxu1 }
0x142a   :  { %v2585_v11 = vpop.eup %2584 }
0x142b   :  { %v1369_v22 = vadd.f32 1.0, %v2585_v11 }
0x142d   :  { %2586 = vrcp.f32 %v1369_v22 }
0x143a   :  { %v2587_v55 = vpop.eup %2586 }
0x143b   :  { %1380 = vrot.lane.b32.xlu0 %v2587_v55, %s2775_s23  ;;  %1372 = vrot.lane.b32.xlu1 %v2587_v55, %s2766_s22 }
0x14ad   :  { %v1373_v51 = vpop.permute.xlu1 %1372  ;;  %v1381_v20 = vpop.permute.xlu0 %1380 }
0x14ae   :  { %v1375_v16 = vmul.f32 %v1374_v14, %v1373_v51  ;;  %v1382_v23 = vsub.f32 1.0, %v1381_v20  ;;  %v1384_v27 = vmul.f32 %v1381_v20, %v1322_v24 }
0x14b0   :  { %v1376_v10 = vadd.f32 %v1375_v16, %v1051_v15  ;;  %v1064_v16 = vadd.f32 %v3302_v13, %v3256_v12 }
0x14b2   :  { %2588 = vtanh.f32 %v1376_v10 }
0x14bf   :  { %v2589_v18 = vpop.eup %2588 }
0x14c0   :  { %1378 = vrot.lane.b32.xlu1 %v2589_v18, %s2766_s22 }
0x1532   :  { %v1379_v25 = vpop.permute.xlu1 %1378 }
0x1533   :  { %v1383_v29 = vmul.f32 %v1382_v23, %v1379_v25 }
0x1535   :  { %v1385_v30 = vadd.f32 %v1384_v27, %v1383_v29 }
0x1537   :  { %v1857_v48 = vpack.c.bf16 %v1385_v30, %v1385_v30  ;;  %v1386_v54 = vsel %vm124_vm1, %v1385_v30, 0.0 }
0x1539   :  { %2378 = vmatmul.mubr.msk.bf16.vlgmr.msra.gmra.mxu0 %vm2971_vm2, %v1857_v48 }
0x153a   :  { %2402 = vmatpush3.bf16.msra.mxu0 %v3170_v44  ;;  %2417 = vmatprep.mubr.msk.bf16.mxu0 %vm2773_vm0, %v2772_v0 }
0x153b   :  { %2403 = vmatprep.subr.bf16.mxu0 %v2772_v0 }
0x153e   :  { %2404 = vmatpush3.bf16.msra.mxu0 %v3174_v45 }
0x153f   :  { %2405 = vmatprep.subr.bf16.mxu0 %v2772_v0 }
0x1542   :  { %2406 = vmatpush3.bf16.msra.mxu0 %v3179_v47 }
0x1543   :  { %2407 = vmatprep.subr.bf16.mxu0 %v2772_v0 }
0x1546   :  { %2408 = vmatpush3.bf16.msra.mxu0 %v3183_v50 }
0x1547   :  { %2409 = vmatprep.subr.bf16.mxu0 %v2772_v0 }
0x154a   :  { %2410 = vmatpush3.bf16.msra.mxu0 %v3187_v52 }
0x154b   :  { %2411 = vmatprep.subr.bf16.mxu0 %v2772_v0 }
0x154e   :  { %2412 = vmatpush3.bf16.msra.mxu0 %v3191_v58 }
0x154f   :  { %2413 = vmatprep.subr.bf16.mxu0 %v2772_v0 }
0x1552   :  { %2414 = vmatpush3.bf16.msra.mxu0 %v3195_v59 }
0x1553   :  { %2415 = vmatprep.subr.bf16.mxu0 %v2772_v0 }
0x1556   :  { %2416 = vmatpush3.bf16.msra.mxu0 %v3199_v60 }
0x1557   :  { %2441 = vmatprep.subr.bf16.mxu0 %v2772_v0 }
0x15f9   :  { %v1423_v31 = vpop.f32.mrf.mxu0 }
0x15fa   :  { %v1429_v33 = vadd.f32 %v1423_v31, %v1056_v26  ;;  %v1438_v28 = vadd.f32 %v3268_v32, %v1423_v31 }
0x15fb   :  { %v2379_v34 = vpop.f32.mrf.mxu0 }
0x15fc   :  { %v1859_v36 = vmul.f32 -1.442695, %v1429_v33 }
0x15fd   :  { %v1426_v37 = vpop.f32.mrf.mxu0 }
0x15fe   :  { %2590 = vpow2.f32 %v1859_v36 }
0x15ff   :  { %v2380_v38 = vpop.f32.mrf.mxu0 }
0x160b   :  { %v2591_v35 = vpop.eup %2590 }
0x160c   :  { %v1433_v39 = vadd.f32 1.0, %v2591_v35 }
0x160e   :  { %2592 = vrcp.f32 %v1433_v39 }
0x161b   :  { %v2593_v57 = vpop.eup %2592 }
0x161c   :  { %1444 = vrot.lane.b32.xlu1 %v2593_v57, %s2775_s23  ;;  %1436 = vrot.lane.b32.xlu0 %v2593_v57, %s2766_s22 }
0x168e   :  { %v1437_v40 = vpop.permute.xlu0 %1436  ;;  %v1445_v9 = vpop.permute.xlu1 %1444 }
0x168f   :  { %v1439_v41 = vmul.f32 %v1438_v28, %v1437_v40  ;;  %v1446_v42 = vsub.f32 1.0, %v1445_v9  ;;  %v1448_v46 = vmul.f32 %v1445_v9, %v1386_v54  ;;  %v1067_v40 = vadd.f32 %v3306_v19, %v3256_v12  ;;  %v2513_v19 = vld [vmem:[#allocation13 + $0x20] sm:$0xff]  }
0x1691   :  { %v1440_v62 = vadd.f32 %v1439_v41, %v1056_v26 }
0x1693   :  { %2594 = vtanh.f32 %v1440_v62 }
0x16a0   :  { %v2595_v21 = vpop.eup %2594 }
0x16a1   :  { %1442 = vrot.lane.b32.xlu0 %v2595_v21, %s2766_s22 }
0x1713   :  { %v1443_v53 = vpop.permute.xlu0 %1442 }
0x1714   :  { %v1447_v2 = vmul.f32 %v1446_v42, %v1443_v53 }
0x1716   :  { %v1449_v4 = vadd.f32 %v1448_v46, %v1447_v2 }
0x1718   :  { %v1861_v6 = vpack.c.bf16 %v1449_v4, %v1449_v4  ;;  %v1450_v7 = vsel %vm124_vm1, %v1449_v4, 0.0  ;;  %v2510_v4 = vld [vmem:[#allocation13 + $0x38] sm:$0xff]  }
0x171a   :  { %2398 = vmatmul.mubr.msk.bf16.vlgmr.msra.gmra.mxu1 %vm2971_vm2, %v1861_v6  ;;  %v2511_v6 = vld [vmem:[#allocation13 + $0x30] sm:$0xff]  }
0x171b   :  { %2422 = vmatpush3.bf16.msra.mxu1 %v3170_v44  ;;  %2437 = vmatprep.mubr.msk.bf16.mxu1 %vm2773_vm0, %v2772_v0  ;;  %v1059_v44 = vadd.f32 %v3256_v12, %v3308_v63  ;;  %v2512_v12 = vld [vmem:[#allocation13 + $0x28] sm:$0xff]  }
0x171c   :  { %2423 = vmatprep.subr.bf16.mxu1 %v2772_v0 }
0x171f   :  { %2424 = vmatpush3.bf16.msra.mxu1 %v3174_v45 }
0x1720   :  { %2425 = vmatprep.subr.bf16.mxu1 %v2772_v0 }
0x1723   :  { %2426 = vmatpush3.bf16.msra.mxu1 %v3179_v47 }
0x1724   :  { %2427 = vmatprep.subr.bf16.mxu1 %v2772_v0 }
0x1727   :  { %2428 = vmatpush3.bf16.msra.mxu1 %v3183_v50 }
0x1728   :  { %2429 = vmatprep.subr.bf16.mxu1 %v2772_v0 }
0x172b   :  { %2430 = vmatpush3.bf16.msra.mxu1 %v3187_v52 }
0x172c   :  { %2431 = vmatprep.subr.bf16.mxu1 %v2772_v0 }
0x172f   :  { %2432 = vmatpush3.bf16.msra.mxu1 %v3191_v58 }
0x1730   :  { %2433 = vmatprep.subr.bf16.mxu1 %v2772_v0 }
0x1733   :  { %2434 = vmatpush3.bf16.msra.mxu1 %v3195_v59 }
0x1734   :  { %2435 = vmatprep.subr.bf16.mxu1 %v2772_v0 }
0x1737   :  { %2436 = vmatpush3.bf16.msra.mxu1 %v3199_v60 }
0x17da   :  { %v1487_v45 = vpop.f32.mrf.mxu1 }
0x17db   :  { %v1493_v47 = vadd.f32 %v1487_v45, %v1059_v44  ;;  %v1502_v59 = vadd.f32 %v3268_v32, %v1487_v45  ;;  %v2515_v45 = vld [vmem:[#allocation13 + $0x10] sm:$0xff]  }
0x17dc   :  { %v2399_v50 = vpop.f32.mrf.mxu1 }
0x17dd   :  { %v1863_v8 = vmul.f32 -1.442695, %v1493_v47  ;;  %v2516_v47 = vld [vmem:[#allocation13 + $0x8] sm:$0xff]  }
0x17de   :  { %v1490_v52 = vpop.f32.mrf.mxu1 }
0x17df   :  { %2596 = vpow2.f32 %v1863_v8 }
0x17e0   :  { %v2400_v61 = vpop.f32.mrf.mxu1 }
0x17ec   :  { %v2597_v15 = vpop.eup %2596 }
0x17ed   :  { %v1497_v58 = vadd.f32 1.0, %v2597_v15  ;;  %v2517_v15 = vld [vmem:[#allocation13] sm:$0xff]  }
0x17ef   :  { %2598 = vrcp.f32 %v1497_v58 }
0x17fc   :  { %v2599_v17 = vpop.eup %2598 }
0x17fd   :  { %1508 = vrot.lane.b32.xlu0 %v2599_v17, %s2775_s23  ;;  %1500 = vrot.lane.b32.xlu1 %v2599_v17, %s2766_s22 }
0x186f   :  { %v1501_v60 = vpop.permute.xlu1 %1500  ;;  %v1509_v56 = vpop.permute.xlu0 %1508 }
0x1870   :  { %v1503_v1 = vmul.f32 %v1502_v59, %v1501_v60  ;;  %v1510_v5 = vsub.f32 1.0, %v1509_v56  ;;  %v1512_v22 = vmul.f32 %v1509_v56, %v1450_v7 }
0x1872   :  { %v1504_v63 = vadd.f32 %v1503_v1, %v1059_v44  ;;  %v2514_v44 = vld [vmem:[#allocation13 + $0x18] sm:$0xff]  }
0x1874   :  { %2600 = vtanh.f32 %v1504_v63 }
0x1881   :  { %v2601_v3 = vpop.eup %2600 }
0x1882   :  { %1506 = vrot.lane.b32.xlu1 %v2601_v3, %s2766_s22 }
0x18f4   :  { %v1507_v11 = vpop.permute.xlu1 %1506 }
0x18f5   :  { %v1511_v55 = vmul.f32 %v1510_v5, %v1507_v11 }
0x18f7   :  { %v1513_v14 = vadd.f32 %v1512_v22, %v1511_v55 }
0x18f9   :  { %v1865_v51 = vpack.c.bf16 %v1513_v14, %v1513_v14  ;;  %v1514_v37 = vsel %vm124_vm1, %v1513_v14, 0.0 }
0x18fb   :  { %2418 = vmatmul.mubr.msk.bf16.vlgmr.msra.gmra.mxu0 %vm2971_vm2, %v1865_v51 }
0x18fc   :  { %2457 = vmatprep.mubr.msk.bf16.mxu0 %vm2773_vm0, %v2772_v0  ;;  %2442 = vmatpush3.bf16.msra.mxu0 %v2510_v4 }
0x18fd   :  { %2443 = vmatprep.subr.bf16.mxu0 %v2772_v0 }
0x1900   :  { %2444 = vmatpush3.bf16.msra.mxu0 %v2511_v6 }
0x1901   :  { %2445 = vmatprep.subr.bf16.mxu0 %v2772_v0 }
0x1904   :  { %2446 = vmatpush3.bf16.msra.mxu0 %v2512_v12 }
0x1905   :  { %2447 = vmatprep.subr.bf16.mxu0 %v2772_v0 }
0x1908   :  { %2448 = vmatpush3.bf16.msra.mxu0 %v2513_v19 }
0x1909   :  { %2449 = vmatprep.subr.bf16.mxu0 %v2772_v0 }
0x190c   :  { %2450 = vmatpush3.bf16.msra.mxu0 %v2514_v44 }
0x190d   :  { %2451 = vmatprep.subr.bf16.mxu0 %v2772_v0 }
0x1910   :  { %2452 = vmatpush3.bf16.msra.mxu0 %v2515_v45 }
0x1911   :  { %2453 = vmatprep.subr.bf16.mxu0 %v2772_v0 }
0x1914   :  { %2454 = vmatpush3.bf16.msra.mxu0 %v2516_v47 }
0x1915   :  { %2455 = vmatprep.subr.bf16.mxu0 %v2772_v0 }
0x1918   :  { %2456 = vmatpush3.bf16.msra.mxu0 %v2517_v15 }
0x19bb   :  { %v1551_v10 = vpop.f32.mrf.mxu0 }
0x19bc   :  { %v1557_v18 = vadd.f32 %v1551_v10, %v1064_v16  ;;  %v1566_v48 = vadd.f32 %v3268_v32, %v1551_v10 }
0x19bd   :  { %v2419_v20 = vpop.f32.mrf.mxu0 }
0x19be   :  { %v1867_v23 = vmul.f32 -1.442695, %v1557_v18 }
0x19bf   :  { %v1554_v24 = vpop.f32.mrf.mxu0 }
0x19c0   :  { %2602 = vpow2.f32 %v1867_v23 }
0x19c1   :  { %v2420_v25 = vpop.f32.mrf.mxu0 }
0x19cd   :  { %v2603_v27 = vpop.eup %2602 }
0x19ce   :  { %v1561_v29 = vadd.f32 1.0, %v2603_v27 }
0x19d0   :  { %2604 = vrcp.f32 %v1561_v29 }
0x19dd   :  { %v2605_v30 = vpop.eup %2604 }
0x19de   :  { %1572 = vrot.lane.b32.xlu1 %v2605_v30, %s2775_s23  ;;  %1564 = vrot.lane.b32.xlu0 %v2605_v30, %s2766_s22 }
0x1a50   :  { %v1565_v26 = vpop.permute.xlu0 %1564  ;;  %v1573_v34 = vpop.permute.xlu1 %1572 }
0x1a51   :  { %v1567_v31 = vmul.f32 %v1566_v48, %v1565_v26  ;;  %v1574_v36 = vsub.f32 1.0, %v1573_v34  ;;  %v1576_v35 = vmul.f32 %v1573_v34, %v1514_v37 }
0x1a53   :  { %v1568_v13 = vadd.f32 %v1567_v31, %v1064_v16 }
0x1a55   :  { %2606 = vtanh.f32 %v1568_v13 }
0x1a62   :  { %v2607_v33 = vpop.eup %2606 }
0x1a63   :  { %1570 = vrot.lane.b32.xlu0 %v2607_v33, %s2766_s22 }
0x1ad5   :  { %v1571_v38 = vpop.permute.xlu0 %1570 }
0x1ad6   :  { %v1575_v39 = vmul.f32 %v1574_v36, %v1571_v38 }
0x1ad8   :  { %v1577_v57 = vadd.f32 %v1576_v35, %v1575_v39 }
0x1ada   :  { %v1869_v28 = vpack.c.bf16 %v1577_v57, %v1577_v57  ;;  %v1578_v60 = vsel %vm124_vm1, %v1577_v57, 0.0 }
0x1adc   :  { %2438 = vmatmul.mubr.msk.bf16.vlgmr.msra.gmra.mxu1 %vm2971_vm2, %v1869_v28 }
0x1b9c   :  { %v1615_v41 = vpop.f32.mrf.mxu1 }
0x1b9d   :  { %v1621_v62 = vadd.f32 %v1615_v41, %v1067_v40  ;;  %v1630_v50 = vadd.f32 %v3268_v32, %v1615_v41  ;;  %v1872_v32 = vld [vmem:[%s3475_s10] ss:$0 sm:$0xff] }
0x1b9e   :  { %v2439_v21 = vpop.f32.mrf.mxu1 }
0x1b9f   :  { %v1871_v9 = vmul.f32 -1.442695, %v1621_v62 }
0x1ba0   :  { %v1618_v42 = vpop.f32.mrf.mxu1 }
0x1ba1   :  { %2608 = vpow2.f32 %v1871_v9 }
0x1ba2   :  { %v2440_v54 = vpop.f32.mrf.mxu1 }
0x1bae   :  { %v2609_v53 = vpop.eup %2608 }
0x1baf   :  { %v1625_v46 = vadd.f32 1.0, %v2609_v53 }
0x1bb1   :  { %2610 = vrcp.f32 %v1625_v46 }
0x1bbe   :  { %v2611_v2 = vpop.eup %2610 }
0x1bbf   :  { %1636 = vrot.lane.b32.xlu0 %v2611_v2, %s2775_s23  ;;  %1628 = vrot.lane.b32.xlu1 %v2611_v2, %s2766_s22 }
0x1c31   :  { %v1629_v8 = vpop.permute.xlu1 %1628  ;;  %v1637_v17 = vpop.permute.xlu0 %1636 }
0x1c32   :  { %v1631_v52 = vmul.f32 %v1630_v50, %v1629_v8  ;;  %v1638_v59 = vsub.f32 1.0, %v1637_v17  ;;  %v1640_v63 = vmul.f32 %v1637_v17, %v1578_v60 }
0x1c34   :  { %v1632_v61 = vadd.f32 %v1631_v52, %v1067_v40 }
0x1c36   :  { %2612 = vtanh.f32 %v1632_v61 }
0x1c43   :  { %v2613_v58 = vpop.eup %2612 }
0x1c44   :  { %1634 = vrot.lane.b32.xlu1 %v2613_v58, %s2766_s22  ;;  %s2734_s22 = scalar_lea.vmem %s1763_s1, 128 }
0x1c45   :  { %p2735_p2 = scmp.ne.s32.totalorder %s1763_s1, %s2734_s22  ;;  %p2740_p4 = scmp.lt.s32.totalorder %s2734_s22, %s2734_s22 }
0x1c47   :  { %p2741_p5 = por %p2740_p4, %p2739_p3 }
0x1c49   :  { %p2742_p6 = pnand %p2741_p5, %p2735_p2 }
0x1cb6   :  { %v1635_v1 = vpop.permute.xlu1 %1634 }
0x1cb7   :  { %v1639_v3 = vmul.f32 %v1638_v59, %v1635_v1 }
0x1cb9   :  { %v1641_v0 = vadd.f32 %v1640_v63, %v1639_v3 }
0x1cbb   :  { %v1882_v56 = vpack.c.bf16 %v1641_v0, %v1641_v0 }
0x1cbd   :  { %2458 = vmatmul.mubr.msk.bf16.vlgmr.msra.gmra.mxu0 %vm2971_vm2, %v1882_v56 }
0x1d7d   :  { %v1749_v5 = vpop.f32.mrf.mxu0 }
0x1d7e   :  { %v1750_v7 = vadd.f32 %v1872_v32, %v1749_v5 }
0x1d7f   :  { %v2459_v11 = vpop.f32.mrf.mxu0 }
0x1d80   :  { %1755 = vst [vmem:[#allocation15] sm:$0xff] %v1750_v7 }
0x1d81   :  { %v1752_v43 = vpop.f32.mrf.mxu0 }
0x1d82   :  { %2745 = shalt.err (!%p2742_p6)
}
0x1d83   :  { %1765 = dma.vmem_to_hbm [thread:$0]  %s1763_s1, 128, %s3476_s11, [#allocation6]   ;;  %v2460_v49 = vpop.f32.mrf.mxu0 }
0x1d84   :  { %2762 = dma.done.wait [#allocation6], 128  }
0x1d85   :  { %2763 = vsyncadd [#allocation6], 4294967168 }
0x1d86   :  { %1769 = vsyncpa [#allocation5], 1 }
0x1d87   :  { %1770 = vsyncpa [#allocation8], 1 }
0x1d88   :  { %1771 = vsyncpa [#allocation11], 1 }
0x1d89   :  { %1772 = vsyncpa [#allocation14], 1 }
0x1d8a   :  { %1773 = vsyncpa [#allocation6], 1 }

</bundles_post_ra>
